<compile_context>
chip_gen: v5e
topology: v5e:2x2
jax: 0.10.0
libtpu: 0.0.40
codegen_flags: <defaults>
</compile_context>

<pallas_src>
import functools

import jax
import jax.numpy as jnp
from jax import lax
from jax.experimental import pallas as pl
from jax.experimental.pallas import tpu as pltpu


# ----------------------------------------------------------------------------
# pltpu.roll convention / availability probe (run once, eagerly, at init)
# ----------------------------------------------------------------------------
@functools.lru_cache(maxsize=None)
def _probe_roll_mode(axis: int) -> str:
    """Detect the rotation convention of pltpu.roll on this backend.

    Returns "jnp"  if pltpu.roll(x, s, axis) == jnp.roll(x, s, axis),
            "neg"  if it rotates the opposite way,
            "none" if it does not lower (fall back to slice+concat).
    """
    hh, ww = 16, 256
    x = jnp.arange(hh * ww, dtype=jnp.float32).reshape(hh, ww)

    def k(x_ref, o_ref):
        o_ref[...] = pltpu.roll(x_ref[...], 1, axis)

    try:
        y = pl.pallas_call(
            k, out_shape=jax.ShapeDtypeStruct((hh, ww), jnp.float32))(x)
        y = jax.block_until_ready(y)
    except Exception:          # lowering / runtime failure -> safe fallback
        return "none"
    if bool(jnp.array_equal(y, jnp.roll(x, 1, axis))):
        return "jnp"
    if bool(jnp.array_equal(y, jnp.roll(x, -1, axis))):
        return "neg"
    return "none"


def _shifted_read(x, offset, axis, mode):
    """out[..., i, ...] = x[..., (i + offset) mod L, ...] along `axis`.

    Wrapped (out-of-range) entries are garbage by design; callers zero them
    via pre-masked weights (lane axis) or the row mask (sublane axis).  Uses
    the XLU rotate slot when pltpu.roll is available.
    """
    size = x.shape[axis]
    off = offset % size
    if off == 0:
        return x
    if mode == "jnp":
        return pltpu.roll(x, (size - off) % size, axis)
    if mode == "neg":
        return pltpu.roll(x, off, axis)
    # fallback: static slices + concatenate (always lowers)
    lo = lax.slice_in_dim(x, off, size, axis=axis)
    hi = lax.slice_in_dim(x, 0, off, axis=axis)
    return lax.concatenate([lo, hi], dimension=axis)


# ----------------------------------------------------------------------------
# Fused FoldBlock-chain kernel: one grid step = one batch tile, all units
# ----------------------------------------------------------------------------
def _fold_chain_kernel(*refs, n_units, fold_num, C, K,
                       lane_mode, sub_mode, approximate_gelu):
    """refs = (x0, [xres_1..xres_{n_units}], wmask, affine, row_ok,
               out_1..out_{n_units})

      x*, out* : (NB*H, W*C)        lane-dense activation tiles
      wmask    : (n_units, K*K, W*C) depthwise weights tiled over lanes, with
                 the "same"-padding lane mask already folded in (zeros where a
                 tap would read across the left/right image edge)
      affine   : (n_units, 3, W*C)   rows = conv bias, BN scale, BN shift
      row_ok   : (K, NB*H, 1)        per-dy row mask (top/bottom image edges)
    """
    n_x = fold_num if fold_num >= 2 else 1
    x_refs = refs[:n_x]
    wmask_ref, affine_ref, rowok_ref = refs[n_x:n_x + 3]
    out_refs = refs[n_x + 3:]
    assert len(out_refs) == n_units
    p = (K - 1) // 2

    x_cur = x_refs[0][...].astype(jnp.float32)         # conv input of unit 0
    for u in range(n_units):
        wm = wmask_ref[u]                               # (K*K, W*C)
        aff = affine_ref[u]                             # (3, W*C)

        # accumulator initialised directly from the lane-tiled conv bias
        acc = jnp.broadcast_to(aff[0][None, :], x_cur.shape)

        for dy in range(K):                             # static unrolled taps
            oy = dy - p
            if oy == 0:
                x_dy = x_cur
            else:
                # sublane shift; rows that would read across the top/bottom
                # image edge are zeroed by the row mask
                x_dy = _shifted_read(x_cur, oy, 0, sub_mode) * rowok_ref[dy]
            for dx in range(K):
                ox = dx - p
                # lane shift (stride C); lanes that would read across the
                # left/right image edge multiply zeroed weights
                x_tap = (x_dy if ox == 0 else
                         _shifted_read(x_dy, ox * C, 1, lane_mode))
                acc = acc + x_tap * wm[dy * K + dx][None, :]

        if approximate_gelu:                            # tanh GELU -> EUP slot
            c0 = 0.7978845608028654                     # sqrt(2/pi)
            g = 0.5 * acc * (1.0 + jnp.tanh(
                c0 * (acc + 0.044715 * acc * acc * acc)))
        else:                                           # exact erf = torch default
            g = 0.5 * acc * (1.0 + lax.erf(acc * 0.7071067811865476))

        y = g * aff[1][None, :] + aff[2][None, :]       # eval-mode BN affine

        res_ref = x_refs[u + 1] if fold_num >= 2 else x_refs[0]
        y = res_ref[...].astype(jnp.float32) + y        # residual add
        out_refs[u][...] = y.astype(out_refs[u].dtype)
        x_cur = y                                       # next unit's conv input


# ----------------------------------------------------------------------------
# Wrapper
# ----------------------------------------------------------------------------
def _pick_batch_tile(N, H, WC, itemsize, fold_num):
    """Images per grid step: big enough to amortise the ~0.35us per-step
    overhead, small enough for VMEM, and >=2 steps when N>=2 (megacore)."""
    per_image = H * WC * itemsize
    n_slabs = fold_num + max(1, fold_num - 1)            # inputs + outputs
    budget = 8 * 1024 * 1024                              # leave VMEM headroom
    cands = [nb for nb in range(1, N + 1)
             if N % nb == 0 and ((nb * H) % 8 == 0 or nb == N)]

    def good(nb):
        fits = 2 * nb * n_slabs * per_image <= budget     # double-buffered
        two_steps = (N < 2) or (N // nb >= 2)
        return fits and two_steps

    ok = [nb for nb in cands if good(nb)]
    return max(ok) if ok else min(cands)


def _fold_block_forward(unit_params, *xs, lane_mode="jnp", sub_mode="jnp",
                        approximate_gelu=False):
    """Fused FoldBlock forward.  xs are NHWC float arrays of shape (N,H,W,C)."""
    fold_num = 1 if len(xs) == 1 else len(xs)
    n_units = len(unit_params)
    assert n_units == max(1, fold_num - 1)

    N, H, W, C = xs[0].shape
    K = unit_params[0]["w"].shape[0]
    assert K % 2 == 1, "even kernel_size not supported ('same' pad asymmetric)"
    p = (K - 1) // 2
    WC = W * C
    dtype = xs[0].dtype
    itemsize = jnp.dtype(dtype).itemsize

    # lane-dense 2-D view: rows = N*H (sublanes), lanes = W*C.
    # Reshape of contiguous NHWC is free in HBM.
    xs2 = [x.reshape(N * H, WC) for x in xs]

    nb = _pick_batch_tile(N, H, WC, itemsize, fold_num)
    nbh = nb * H
    grid = (N // nb,)

    # --- fold the zero-padding lane mask into pre-tiled depthwise weights ---
    wpos = jnp.arange(W)
    offs = jnp.arange(K) - p
    lane_ok = ((wpos[None, :] + offs[:, None] >= 0) &
               (wpos[None, :] + offs[:, None] < W))             # (K, W) [dx,w]
    lane_ok = jnp.repeat(lane_ok, C, axis=1)                    # (K, W*C)
    lane_ok = jnp.tile(lane_ok, (K, 1)).astype(jnp.float32)     # (K*K, W*C)

    wmask, affine = [], []
    for prm in unit_params:
        w = prm["w"].astype(jnp.float32)                        # (K, K, C)
        w_lanes = jnp.tile(w.reshape(K * K, 1, C),
                           (1, W, 1)).reshape(K * K, WC)
        wmask.append(w_lanes * lane_ok)
        affine.append(jnp.stack([
            jnp.tile(prm["b"].astype(jnp.float32), W),
            jnp.tile(prm["scale"].astype(jnp.float32), W),
            jnp.tile(prm["shift"].astype(jnp.float32), W)]))
    wmask = jnp.stack(wmask)            # (n_units, K*K, W*C)
    affine = jnp.stack(affine)          # (n_units, 3, W*C)

    # per-dy row validity mask (zero rows reading across the image top/bottom)
    y_img = jnp.tile(jnp.arange(H), nb)                         # (nbh,)
    row_ok = ((y_img[None, :] + offs[:, None] >= 0) &
              (y_img[None, :] + offs[:, None] < H)).astype(jnp.float32)
    row_ok = row_ok[:, :, None]                                 # (K, nbh, 1)

    kern = functools.partial(
        _fold_chain_kernel, n_units=n_units, fold_num=fold_num, C=C, K=K,
        lane_mode=lane_mode, sub_mode=sub_mode,
        approximate_gelu=approximate_gelu)

    x_spec = pl.BlockSpec((nbh, WC), lambda n: (n, 0))
    in_specs = ([x_spec] * len(xs2) +
                [pl.BlockSpec((n_units, K * K, WC), lambda n: (0, 0, 0)),
                 pl.BlockSpec((n_units, 3, WC), lambda n: (0, 0, 0)),
                 pl.BlockSpec((K, nbh, 1), lambda n: (0, 0, 0))])
    out_specs = tuple(pl.BlockSpec((nbh, WC), lambda n: (n, 0))
                      for _ in range(n_units))
    out_shape = tuple(jax.ShapeDtypeStruct((N * H, WC), dtype)
                      for _ in range(n_units))

    # xs[i+1] += Unit(xs[i]): reuse each residual's HBM buffer for its output
    io_alias = ({u: u - 1 for u in range(1, n_units + 1)} if fold_num >= 2
                else {0: 0})

    ys = pl.pallas_call(
        kern,
        grid=grid,
        in_specs=in_specs,
        out_specs=out_specs,
        out_shape=out_shape,
        input_output_aliases=io_alias,
        compiler_params=pltpu.CompilerParams(
            dimension_semantics=("parallel",)),
    )(*xs2, wmask, affine, row_ok)

    ys = [y.reshape(N, H, W, C) for y in ys]
    if fold_num == 1:
        return (ys[0],)
    outs = [xs[0]] + ys
    outs.reverse()
    return tuple(outs)


def init_unit_params(key, hidden_dim, kernel_size, eps=1e-5):
    k1, k2, k3, k4, k5, k6 = jax.random.split(key, 6)
    C, K = hidden_dim, kernel_size
    w = 0.1 * jax.random.normal(k1, (K, K, C), jnp.float32)     # depthwise W
    b = 0.1 * jax.random.normal(k2, (C,), jnp.float32)          # conv bias
    gamma = 1.0 + 0.1 * jax.random.normal(k3, (C,), jnp.float32)
    beta = 0.1 * jax.random.normal(k4, (C,), jnp.float32)
    run_mean = 0.1 * jax.random.normal(k5, (C,), jnp.float32)
    run_var = jax.random.uniform(k6, (C,), jnp.float32, 0.5, 1.5)
    scale = gamma / jnp.sqrt(run_var + eps)
    shift = beta - run_mean * scale
    return {"w": w, "b": b, "scale": scale, "shift": shift}


class FoldBlockPallas:
    """FoldBlock with Unit = BN_eval(GELU(DepthwiseConv2d(., k, 'same'))).
    Inputs / outputs are NHWC arrays."""

    def __init__(self, fold_num, hidden_dim, kernel_size, key,
                 approximate_gelu=False):
        assert kernel_size % 2 == 1, "only odd kernel_size supported"
        self.fold_num = fold_num
        n_units = max(1, fold_num - 1)
        keys = jax.random.split(key, n_units)
        self.unit_params = [init_unit_params(keys[i], hidden_dim, kernel_size)
                            for i in range(n_units)]
        # detect pltpu.roll convention / availability once (eagerly)
        lane_mode = _probe_roll_mode(1)
        sub_mode = _probe_roll_mode(0)
        self._forward = jax.jit(functools.partial(
            _fold_block_forward, lane_mode=lane_mode, sub_mode=sub_mode,
            approximate_gelu=approximate_gelu))

    def __call__(self, *xs):
        assert len(xs) == (1 if self.fold_num == 1 else self.fold_num)
        return list(self._forward(self.unit_params, *xs))


# ----------------------------------------------------------------------------
# Pure-JAX reference (sanity check)
# ----------------------------------------------------------------------------
def _unit_ref(params, x):
    C = x.shape[-1]
    w = params["w"][:, :, None, :]                 # (K, K, 1, C) HWIO
    y = lax.conv_general_dilated(
        x, w, window_strides=(1, 1), padding="SAME",
        dimension_numbers=("NHWC", "HWIO", "NHWC"), feature_group_count=C)
    y = y + params["b"][None, None, None, :]
    y = jax.nn.gelu(y, approximate=False)
    return y * params["scale"] + params["shift"]


def _fold_block_ref(block, *xs):
    xs = list(xs)
    if block.fold_num == 1:
        xs[0] = xs[0] + _unit_ref(block.unit_params[0], xs[0])
        return xs
    for i in range(block.fold_num - 1):
        xs[i + 1] = xs[i + 1] + _unit_ref(block.unit_params[i], xs[i])
    xs.reverse()
    return xs


# ----------------------------------------------------------------------------
if __name__ == "__main__":
    fold_num = 2
    N, C, H, W = 2, 32, 16, 16          # PyTorch NCHW shapes: (2, 32, 16, 16)
    kernel_size = 5

    root = jax.random.PRNGKey(0)
    k_param, k_x0, k_x1 = jax.random.split(root, 3)

    block = FoldBlockPallas(fold_num, C, kernel_size, k_param)

    # construct NCHW inputs (PyTorch convention), convert to NHWC for the kernel
    x0_nchw = jax.random.normal(k_x0, (N, C, H, W), jnp.float32)
    x1_nchw = jax.random.normal(k_x1, (N, C, H, W), jnp.float32)
    x0 = jnp.transpose(x0_nchw, (0, 2, 3, 1))
    x1 = jnp.transpose(x1_nchw, (0, 2, 3, 1))

    # reference first (keeps the check independent of output buffer aliasing)
    ref_outs = _fold_block_ref(block, x0, x1)

    outs = block(x0, x1)
    outs = [jax.block_until_ready(o) for o in outs]

    for o, r in zip(outs, ref_outs):
        assert o.shape == r.shape
        err = float(jnp.max(jnp.abs(o - r)))
        assert err < 1e-3, f"kernel mismatch vs reference: {err}"

    print("KERNEL_OK")
</pallas_src>

<mosaic_0001>
module attributes {stable_mosaic.version = 11 : i64} {
  func.func @k(%arg0: memref<16x256xf32, #tpu.memory_space<vmem>>, %arg1: memref<16x256xf32, #tpu.memory_space<vmem>>) attributes {dimension_semantics = [], scalar_prefetch = 0 : i64, scratch_operands = 0 : i64, tpu.core_type = #tpu.core_type<tc>} {
    %c0 = arith.constant 0 : index
    %c0_0 = arith.constant 0 : index
    %0 = vector.load %arg0[%c0, %c0_0] : memref<16x256xf32, #tpu.memory_space<vmem>>, vector<16x256xf32>
    %c1_i32 = arith.constant 1 : i32
    %1 = tpu.dynamic_rotate %0 by %c1_i32 dim 1 : vector<16x256xf32>, i32 -> vector<16x256xf32>
    %c0_1 = arith.constant 0 : index
    %c0_2 = arith.constant 0 : index
    %2 = vector.load %arg1[%c0_1, %c0_2] : memref<16x256xf32, #tpu.memory_space<vmem>>, vector<16x256xf32>
    tpu.vector_store %arg1[%c0_1, %c0_2], %1 {strides = array<i32>} : memref<16x256xf32, #tpu.memory_space<vmem>>, vector<16x256xf32>,
    return
  }
}

module attributes {stable_mosaic.version = 11 : i64} {
  func.func @k(%arg0: memref<16x256xf32, #tpu.memory_space<vmem>>, %arg1: memref<16x256xf32, #tpu.memory_space<vmem>>) attributes {dimension_semantics = [], scalar_prefetch = 0 : i64, scratch_operands = 0 : i64, tpu.core_type = #tpu.core_type<tc>} {
    %c0 = arith.constant 0 : index
    %c0_0 = arith.constant 0 : index
    %0 = vector.load %arg0[%c0, %c0_0] : memref<16x256xf32, #tpu.memory_space<vmem>>, vector<16x256xf32>
    %c1_i32 = arith.constant 1 : i32
    %1 = tpu.dynamic_rotate %0 by %c1_i32 dim 0 : vector<16x256xf32>, i32 -> vector<16x256xf32>
    %c0_1 = arith.constant 0 : index
    %c0_2 = arith.constant 0 : index
    %2 = vector.load %arg1[%c0_1, %c0_2] : memref<16x256xf32, #tpu.memory_space<vmem>>, vector<16x256xf32>
    tpu.vector_store %arg1[%c0_1, %c0_2], %1 {strides = array<i32>} : memref<16x256xf32, #tpu.memory_space<vmem>>, vector<16x256xf32>,
    return
  }
}

module attributes {stable_mosaic.version = 11 : i64} {
  func.func @_fold_chain_kernel(%arg0: i32, %arg1: memref<16x512xf32, #tpu.memory_space<vmem>>, %arg2: memref<16x512xf32, #tpu.memory_space<vmem>>, %arg3: memref<1x25x512xf32, #tpu.memory_space<vmem>>, %arg4: memref<1x3x512xf32, #tpu.memory_space<vmem>>, %arg5: memref<5x16x1xf32, #tpu.memory_space<vmem>>, %arg6: memref<16x512xf32, #tpu.memory_space<vmem>>) attributes {dimension_semantics = [#tpu.dimension_semantics<parallel>], iteration_bounds = array<i64: 2>, scalar_prefetch = 0 : i64, scratch_operands = 0 : i64, tpu.core_type = #tpu.core_type<tc>, window_params = [{transform_indices = @transform_0, window_bounds = array<i64: 16, 512>}, {transform_indices = @transform_1, window_bounds = array<i64: 16, 512>}, {pipeline_mode = #tpu.pipeline_mode<synchronous>, transform_indices = @transform_2, window_bounds = array<i64: 1, 25, 512>}, {pipeline_mode = #tpu.pipeline_mode<synchronous>, transform_indices = @transform_3, window_bounds = array<i64: 1, 3, 512>}, {pipeline_mode = #tpu.pipeline_mode<synchronous>, transform_indices = @transform_4, window_bounds = array<i64: 5, 16, 1>}, {transform_indices = @transform_5, window_bounds = array<i64: 16, 512>}]} {
    %c0 = arith.constant 0 : index
    %c0_0 = arith.constant 0 : index
    %0 = vector.load %arg1[%c0, %c0_0] : memref<16x512xf32, #tpu.memory_space<vmem>>, vector<16x512xf32>
    %c0_1 = arith.constant 0 : index
    %c0_2 = arith.constant 0 : index
    %c0_3 = arith.constant 0 : index
    %1 = vector.load %arg3[%c0_1, %c0_2, %c0_3] : memref<1x25x512xf32, #tpu.memory_space<vmem>>, vector<1x25x512xf32>
    %2 = vector.shape_cast %1 : vector<1x25x512xf32> to vector<25x512xf32>
    %c0_4 = arith.constant 0 : index
    %c0_5 = arith.constant 0 : index
    %c0_6 = arith.constant 0 : index
    %3 = vector.load %arg4[%c0_4, %c0_5, %c0_6] : memref<1x3x512xf32, #tpu.memory_space<vmem>>, vector<1x3x512xf32>
    %4 = vector.shape_cast %3 : vector<1x3x512xf32> to vector<3x512xf32>
    %5 = vector.extract_strided_slice %4 {offsets = [0, 0], sizes = [1, 512], strides = [1, 1]} : vector<3x512xf32> to vector<1x512xf32>
    %6 = vector.shape_cast %5 : vector<1x512xf32> to vector<512xf32>
    %7 = vector.shape_cast %6 : vector<512xf32> to vector<1x512xf32>
    %8 = vector.shape_cast %7 : vector<1x512xf32> to vector<1x512xf32>
    %9 = vector.broadcast %8 : vector<1x512xf32> to vector<16x512xf32>
    %10 = vector.extract_strided_slice %0 {offsets = [14, 0], sizes = [2, 512], strides = [1, 1]} : vector<16x512xf32> to vector<2x512xf32>
    %11 = vector.extract_strided_slice %0 {offsets = [0, 0], sizes = [14, 512], strides = [1, 1]} : vector<16x512xf32> to vector<14x512xf32>
    %12 = tpu.concatenate %10, %11 in 0 : vector<2x512xf32>, vector<14x512xf32> -> vector<16x512xf32>
    %c0_7 = arith.constant 0 : index
    %c0_8 = arith.constant 0 : index
    %c0_9 = arith.constant 0 : index
    %13 = vector.load %arg5[%c0_7, %c0_8, %c0_9] : memref<5x16x1xf32, #tpu.memory_space<vmem>>, vector<1x16x1xf32>
    %14 = vector.shape_cast %13 : vector<1x16x1xf32> to vector<16x1xf32>
    %15 = vector.broadcast %14 : vector<16x1xf32> to vector<16x512xf32>
    %16 = arith.mulf %12, %15 : vector<16x512xf32>
    %17 = vector.extract_strided_slice %16 {offsets = [0, 448], sizes = [16, 64], strides = [1, 1]} : vector<16x512xf32> to vector<16x64xf32>
    %18 = vector.extract_strided_slice %16 {offsets = [0, 0], sizes = [16, 448], strides = [1, 1]} : vector<16x512xf32> to vector<16x448xf32>
    %19 = tpu.concatenate %17, %18 in 1 : vector<16x64xf32>, vector<16x448xf32> -> vector<16x512xf32>
    %20 = vector.extract_strided_slice %2 {offsets = [0, 0], sizes = [1, 512], strides = [1, 1]} : vector<25x512xf32> to vector<1x512xf32>
    %21 = vector.shape_cast %20 : vector<1x512xf32> to vector<512xf32>
    %22 = vector.shape_cast %21 : vector<512xf32> to vector<1x512xf32>
    %23 = vector.broadcast %22 : vector<1x512xf32> to vector<16x512xf32>
    %24 = arith.mulf %19, %23 : vector<16x512xf32>
    %25 = arith.addf %9, %24 : vector<16x512xf32>
    %26 = vector.extract_strided_slice %16 {offsets = [0, 480], sizes = [16, 32], strides = [1, 1]} : vector<16x512xf32> to vector<16x32xf32>
    %27 = vector.extract_strided_slice %16 {offsets = [0, 0], sizes = [16, 480], strides = [1, 1]} : vector<16x512xf32> to vector<16x480xf32>
    %28 = tpu.concatenate %26, %27 in 1 : vector<16x32xf32>, vector<16x480xf32> -> vector<16x512xf32>
    %29 = vector.extract_strided_slice %2 {offsets = [1, 0], sizes = [1, 512], strides = [1, 1]} : vector<25x512xf32> to vector<1x512xf32>
    %30 = vector.shape_cast %29 : vector<1x512xf32> to vector<512xf32>
    %31 = vector.shape_cast %30 : vector<512xf32> to vector<1x512xf32>
    %32 = vector.broadcast %31 : vector<1x512xf32> to vector<16x512xf32>
    %33 = arith.mulf %28, %32 : vector<16x512xf32>
    %34 = arith.addf %25, %33 : vector<16x512xf32>
    %35 = vector.extract_strided_slice %2 {offsets = [2, 0], sizes = [1, 512], strides = [1, 1]} : vector<25x512xf32> to vector<1x512xf32>
    %36 = vector.shape_cast %35 : vector<1x512xf32> to vector<512xf32>
    %37 = vector.shape_cast %36 : vector<512xf32> to vector<1x512xf32>
    %38 = vector.broadcast %37 : vector<1x512xf32> to vector<16x512xf32>
    %39 = arith.mulf %16, %38 : vector<16x512xf32>
    %40 = arith.addf %34, %39 : vector<16x512xf32>
    %41 = vector.extract_strided_slice %16 {offsets = [0, 32], sizes = [16, 480], strides = [1, 1]} : vector<16x512xf32> to vector<16x480xf32>
    %42 = vector.extract_strided_slice %16 {offsets = [0, 0], sizes = [16, 32], strides = [1, 1]} : vector<16x512xf32> to vector<16x32xf32>
    %43 = tpu.concatenate %41, %42 in 1 : vector<16x480xf32>, vector<16x32xf32> -> vector<16x512xf32>
    %44 = vector.extract_strided_slice %2 {offsets = [3, 0], sizes = [1, 512], strides = [1, 1]} : vector<25x512xf32> to vector<1x512xf32>
    %45 = vector.shape_cast %44 : vector<1x512xf32> to vector<512xf32>
    %46 = vector.shape_cast %45 : vector<512xf32> to vector<1x512xf32>
    %47 = vector.broadcast %46 : vector<1x512xf32> to vector<16x512xf32>
    %48 = arith.mulf %43, %47 : vector<16x512xf32>
    %49 = arith.addf %40, %48 : vector<16x512xf32>
    %50 = vector.extract_strided_slice %16 {offsets = [0, 64], sizes = [16, 448], strides = [1, 1]} : vector<16x512xf32> to vector<16x448xf32>
    %51 = vector.extract_strided_slice %16 {offsets = [0, 0], sizes = [16, 64], strides = [1, 1]} : vector<16x512xf32> to vector<16x64xf32>
    %52 = tpu.concatenate %50, %51 in 1 : vector<16x448xf32>, vector<16x64xf32> -> vector<16x512xf32>
    %53 = vector.extract_strided_slice %2 {offsets = [4, 0], sizes = [1, 512], strides = [1, 1]} : vector<25x512xf32> to vector<1x512xf32>
    %54 = vector.shape_cast %53 : vector<1x512xf32> to vector<512xf32>
    %55 = vector.shape_cast %54 : vector<512xf32> to vector<1x512xf32>
    %56 = vector.broadcast %55 : vector<1x512xf32> to vector<16x512xf32>
    %57 = arith.mulf %52, %56 : vector<16x512xf32>
    %58 = arith.addf %49, %57 : vector<16x512xf32>
    %59 = vector.extract_strided_slice %0 {offsets = [15, 0], sizes = [1, 512], strides = [1, 1]} : vector<16x512xf32> to vector<1x512xf32>
    %60 = vector.extract_strided_slice %0 {offsets = [0, 0], sizes = [15, 512], strides = [1, 1]} : vector<16x512xf32> to vector<15x512xf32>
    %61 = tpu.concatenate %59, %60 in 0 : vector<1x512xf32>, vector<15x512xf32> -> vector<16x512xf32>
    %c1 = arith.constant 1 : index
    %c0_10 = arith.constant 0 : index
    %c0_11 = arith.constant 0 : index
    %62 = vector.load %arg5[%c1, %c0_10, %c0_11] : memref<5x16x1xf32, #tpu.memory_space<vmem>>, vector<1x16x1xf32>
    %63 = vector.shape_cast %62 : vector<1x16x1xf32> to vector<16x1xf32>
    %64 = vector.broadcast %63 : vector<16x1xf32> to vector<16x512xf32>
    %65 = arith.mulf %61, %64 : vector<16x512xf32>
    %66 = vector.extract_strided_slice %65 {offsets = [0, 448], sizes = [16, 64], strides = [1, 1]} : vector<16x512xf32> to vector<16x64xf32>
    %67 = vector.extract_strided_slice %65 {offsets = [0, 0], sizes = [16, 448], strides = [1, 1]} : vector<16x512xf32> to vector<16x448xf32>
    %68 = tpu.concatenate %66, %67 in 1 : vector<16x64xf32>, vector<16x448xf32> -> vector<16x512xf32>
    %69 = vector.extract_strided_slice %2 {offsets = [5, 0], sizes = [1, 512], strides = [1, 1]} : vector<25x512xf32> to vector<1x512xf32>
    %70 = vector.shape_cast %69 : vector<1x512xf32> to vector<512xf32>
    %71 = vector.shape_cast %70 : vector<512xf32> to vector<1x512xf32>
    %72 = vector.broadcast %71 : vector<1x512xf32> to vector<16x512xf32>
    %73 = arith.mulf %68, %72 : vector<16x512xf32>
    %74 = arith.addf %58, %73 : vector<16x512xf32>
    %75 = vector.extract_strided_slice %65 {offsets = [0, 480], sizes = [16, 32], strides = [1, 1]} : vector<16x512xf32> to vector<16x32xf32>
    %76 = vector.extract_strided_slice %65 {offsets = [0, 0], sizes = [16, 480], strides = [1, 1]} : vector<16x512xf32> to vector<16x480xf32>
    %77 = tpu.concatenate %75, %76 in 1 : vector<16x32xf32>, vector<16x480xf32> -> vector<16x512xf32>
    %78 = vector.extract_strided_slice %2 {offsets = [6, 0], sizes = [1, 512], strides = [1, 1]} : vector<25x512xf32> to vector<1x512xf32>
    %79 = vector.shape_cast %78 : vector<1x512xf32> to vector<512xf32>
    %80 = vector.shape_cast %79 : vector<512xf32> to vector<1x512xf32>
    %81 = vector.broadcast %80 : vector<1x512xf32> to vector<16x512xf32>
    %82 = arith.mulf %77, %81 : vector<16x512xf32>
    %83 = arith.addf %74, %82 : vector<16x512xf32>
    %84 = vector.extract_strided_slice %2 {offsets = [7, 0], sizes = [1, 512], strides = [1, 1]} : vector<25x512xf32> to vector<1x512xf32>
    %85 = vector.shape_cast %84 : vector<1x512xf32> to vector<512xf32>
    %86 = vector.shape_cast %85 : vector<512xf32> to vector<1x512xf32>
    %87 = vector.broadcast %86 : vector<1x512xf32> to vector<16x512xf32>
    %88 = arith.mulf %65, %87 : vector<16x512xf32>
    %89 = arith.addf %83, %88 : vector<16x512xf32>
    %90 = vector.extract_strided_slice %65 {offsets = [0, 32], sizes = [16, 480], strides = [1, 1]} : vector<16x512xf32> to vector<16x480xf32>
    %91 = vector.extract_strided_slice %65 {offsets = [0, 0], sizes = [16, 32], strides = [1, 1]} : vector<16x512xf32> to vector<16x32xf32>
    %92 = tpu.concatenate %90, %91 in 1 : vector<16x480xf32>, vector<16x32xf32> -> vector<16x512xf32>
    %93 = vector.extract_strided_slice %2 {offsets = [8, 0], sizes = [1, 512], strides = [1, 1]} : vector<25x512xf32> to vector<1x512xf32>
    %94 = vector.shape_cast %93 : vector<1x512xf32> to vector<512xf32>
    %95 = vector.shape_cast %94 : vector<512xf32> to vector<1x512xf32>
    %96 = vector.broadcast %95 : vector<1x512xf32> to vector<16x512xf32>
    %97 = arith.mulf %92, %96 : vector<16x512xf32>
    %98 = arith.addf %89, %97 : vector<16x512xf32>
    %99 = vector.extract_strided_slice %65 {offsets = [0, 64], sizes = [16, 448], strides = [1, 1]} : vector<16x512xf32> to vector<16x448xf32>
    %100 = vector.extract_strided_slice %65 {offsets = [0, 0], sizes = [16, 64], strides = [1, 1]} : vector<16x512xf32> to vector<16x64xf32>
    %101 = tpu.concatenate %99, %100 in 1 : vector<16x448xf32>, vector<16x64xf32> -> vector<16x512xf32>
    %102 = vector.extract_strided_slice %2 {offsets = [9, 0], sizes = [1, 512], strides = [1, 1]} : vector<25x512xf32> to vector<1x512xf32>
    %103 = vector.shape_cast %102 : vector<1x512xf32> to vector<512xf32>
    %104 = vector.shape_cast %103 : vector<512xf32> to vector<1x512xf32>
    %105 = vector.broadcast %104 : vector<1x512xf32> to vector<16x512xf32>
    %106 = arith.mulf %101, %105 : vector<16x512xf32>
    %107 = arith.addf %98, %106 : vector<16x512xf32>
    %108 = vector.extract_strided_slice %0 {offsets = [0, 448], sizes = [16, 64], strides = [1, 1]} : vector<16x512xf32> to vector<16x64xf32>
    %109 = vector.extract_strided_slice %0 {offsets = [0, 0], sizes = [16, 448], strides = [1, 1]} : vector<16x512xf32> to vector<16x448xf32>
    %110 = tpu.concatenate %108, %109 in 1 : vector<16x64xf32>, vector<16x448xf32> -> vector<16x512xf32>
    %111 = vector.extract_strided_slice %2 {offsets = [10, 0], sizes = [1, 512], strides = [1, 1]} : vector<25x512xf32> to vector<1x512xf32>
    %112 = vector.shape_cast %111 : vector<1x512xf32> to vector<512xf32>
    %113 = vector.shape_cast %112 : vector<512xf32> to vector<1x512xf32>
    %114 = vector.broadcast %113 : vector<1x512xf32> to vector<16x512xf32>
    %115 = arith.mulf %110, %114 : vector<16x512xf32>
    %116 = arith.addf %107, %115 : vector<16x512xf32>
    %117 = vector.extract_strided_slice %0 {offsets = [0, 480], sizes = [16, 32], strides = [1, 1]} : vector<16x512xf32> to vector<16x32xf32>
    %118 = vector.extract_strided_slice %0 {offsets = [0, 0], sizes = [16, 480], strides = [1, 1]} : vector<16x512xf32> to vector<16x480xf32>
    %119 = tpu.concatenate %117, %118 in 1 : vector<16x32xf32>, vector<16x480xf32> -> vector<16x512xf32>
    %120 = vector.extract_strided_slice %2 {offsets = [11, 0], sizes = [1, 512], strides = [1, 1]} : vector<25x512xf32> to vector<1x512xf32>
    %121 = vector.shape_cast %120 : vector<1x512xf32> to vector<512xf32>
    %122 = vector.shape_cast %121 : vector<512xf32> to vector<1x512xf32>
    %123 = vector.broadcast %122 : vector<1x512xf32> to vector<16x512xf32>
    %124 = arith.mulf %119, %123 : vector<16x512xf32>
    %125 = arith.addf %116, %124 : vector<16x512xf32>
    %126 = vector.extract_strided_slice %2 {offsets = [12, 0], sizes = [1, 512], strides = [1, 1]} : vector<25x512xf32> to vector<1x512xf32>
    %127 = vector.shape_cast %126 : vector<1x512xf32> to vector<512xf32>
    %128 = vector.shape_cast %127 : vector<512xf32> to vector<1x512xf32>
    %129 = vector.broadcast %128 : vector<1x512xf32> to vector<16x512xf32>
    %130 = arith.mulf %0, %129 : vector<16x512xf32>
    %131 = arith.addf %125, %130 : vector<16x512xf32>
    %132 = vector.extract_strided_slice %0 {offsets = [0, 32], sizes = [16, 480], strides = [1, 1]} : vector<16x512xf32> to vector<16x480xf32>
    %133 = vector.extract_strided_slice %0 {offsets = [0, 0], sizes = [16, 32], strides = [1, 1]} : vector<16x512xf32> to vector<16x32xf32>
    %134 = tpu.concatenate %132, %133 in 1 : vector<16x480xf32>, vector<16x32xf32> -> vector<16x512xf32>
    %135 = vector.extract_strided_slice %2 {offsets = [13, 0], sizes = [1, 512], strides = [1, 1]} : vector<25x512xf32> to vector<1x512xf32>
    %136 = vector.shape_cast %135 : vector<1x512xf32> to vector<512xf32>
    %137 = vector.shape_cast %136 : vector<512xf32> to vector<1x512xf32>
    %138 = vector.broadcast %137 : vector<1x512xf32> to vector<16x512xf32>
    %139 = arith.mulf %134, %138 : vector<16x512xf32>
    %140 = arith.addf %131, %139 : vector<16x512xf32>
    %141 = vector.extract_strided_slice %0 {offsets = [0, 64], sizes = [16, 448], strides = [1, 1]} : vector<16x512xf32> to vector<16x448xf32>
    %142 = vector.extract_strided_slice %0 {offsets = [0, 0], sizes = [16, 64], strides = [1, 1]} : vector<16x512xf32> to vector<16x64xf32>
    %143 = tpu.concatenate %141, %142 in 1 : vector<16x448xf32>, vector<16x64xf32> -> vector<16x512xf32>
    %144 = vector.extract_strided_slice %2 {offsets = [14, 0], sizes = [1, 512], strides = [1, 1]} : vector<25x512xf32> to vector<1x512xf32>
    %145 = vector.shape_cast %144 : vector<1x512xf32> to vector<512xf32>
    %146 = vector.shape_cast %145 : vector<512xf32> to vector<1x512xf32>
    %147 = vector.broadcast %146 : vector<1x512xf32> to vector<16x512xf32>
    %148 = arith.mulf %143, %147 : vector<16x512xf32>
    %149 = arith.addf %140, %148 : vector<16x512xf32>
    %150 = vector.extract_strided_slice %0 {offsets = [1, 0], sizes = [15, 512], strides = [1, 1]} : vector<16x512xf32> to vector<15x512xf32>
    %151 = vector.extract_strided_slice %0 {offsets = [0, 0], sizes = [1, 512], strides = [1, 1]} : vector<16x512xf32> to vector<1x512xf32>
    %152 = tpu.concatenate %150, %151 in 0 : vector<15x512xf32>, vector<1x512xf32> -> vector<16x512xf32>
    %c3 = arith.constant 3 : index
    %c0_12 = arith.constant 0 : index
    %c0_13 = arith.constant 0 : index
    %153 = vector.load %arg5[%c3, %c0_12, %c0_13] : memref<5x16x1xf32, #tpu.memory_space<vmem>>, vector<1x16x1xf32>
    %154 = vector.shape_cast %153 : vector<1x16x1xf32> to vector<16x1xf32>
    %155 = vector.broadcast %154 : vector<16x1xf32> to vector<16x512xf32>
    %156 = arith.mulf %152, %155 : vector<16x512xf32>
    %157 = vector.extract_strided_slice %156 {offsets = [0, 448], sizes = [16, 64], strides = [1, 1]} : vector<16x512xf32> to vector<16x64xf32>
    %158 = vector.extract_strided_slice %156 {offsets = [0, 0], sizes = [16, 448], strides = [1, 1]} : vector<16x512xf32> to vector<16x448xf32>
    %159 = tpu.concatenate %157, %158 in 1 : vector<16x64xf32>, vector<16x448xf32> -> vector<16x512xf32>
    %160 = vector.extract_strided_slice %2 {offsets = [15, 0], sizes = [1, 512], strides = [1, 1]} : vector<25x512xf32> to vector<1x512xf32>
    %161 = vector.shape_cast %160 : vector<1x512xf32> to vector<512xf32>
    %162 = vector.shape_cast %161 : vector<512xf32> to vector<1x512xf32>
    %163 = vector.broadcast %162 : vector<1x512xf32> to vector<16x512xf32>
    %164 = arith.mulf %159, %163 : vector<16x512xf32>
    %165 = arith.addf %149, %164 : vector<16x512xf32>
    %166 = vector.extract_strided_slice %156 {offsets = [0, 480], sizes = [16, 32], strides = [1, 1]} : vector<16x512xf32> to vector<16x32xf32>
    %167 = vector.extract_strided_slice %156 {offsets = [0, 0], sizes = [16, 480], strides = [1, 1]} : vector<16x512xf32> to vector<16x480xf32>
    %168 = tpu.concatenate %166, %167 in 1 : vector<16x32xf32>, vector<16x480xf32> -> vector<16x512xf32>
    %169 = vector.extract_strided_slice %2 {offsets = [16, 0], sizes = [1, 512], strides = [1, 1]} : vector<25x512xf32> to vector<1x512xf32>
    %170 = vector.shape_cast %169 : vector<1x512xf32> to vector<512xf32>
    %171 = vector.shape_cast %170 : vector<512xf32> to vector<1x512xf32>
    %172 = vector.broadcast %171 : vector<1x512xf32> to vector<16x512xf32>
    %173 = arith.mulf %168, %172 : vector<16x512xf32>
    %174 = arith.addf %165, %173 : vector<16x512xf32>
    %175 = vector.extract_strided_slice %2 {offsets = [17, 0], sizes = [1, 512], strides = [1, 1]} : vector<25x512xf32> to vector<1x512xf32>
    %176 = vector.shape_cast %175 : vector<1x512xf32> to vector<512xf32>
    %177 = vector.shape_cast %176 : vector<512xf32> to vector<1x512xf32>
    %178 = vector.broadcast %177 : vector<1x512xf32> to vector<16x512xf32>
    %179 = arith.mulf %156, %178 : vector<16x512xf32>
    %180 = arith.addf %174, %179 : vector<16x512xf32>
    %181 = vector.extract_strided_slice %156 {offsets = [0, 32], sizes = [16, 480], strides = [1, 1]} : vector<16x512xf32> to vector<16x480xf32>
    %182 = vector.extract_strided_slice %156 {offsets = [0, 0], sizes = [16, 32], strides = [1, 1]} : vector<16x512xf32> to vector<16x32xf32>
    %183 = tpu.concatenate %181, %182 in 1 : vector<16x480xf32>, vector<16x32xf32> -> vector<16x512xf32>
    %184 = vector.extract_strided_slice %2 {offsets = [18, 0], sizes = [1, 512], strides = [1, 1]} : vector<25x512xf32> to vector<1x512xf32>
    %185 = vector.shape_cast %184 : vector<1x512xf32> to vector<512xf32>
    %186 = vector.shape_cast %185 : vector<512xf32> to vector<1x512xf32>
    %187 = vector.broadcast %186 : vector<1x512xf32> to vector<16x512xf32>
    %188 = arith.mulf %183, %187 : vector<16x512xf32>
    %189 = arith.addf %180, %188 : vector<16x512xf32>
    %190 = vector.extract_strided_slice %156 {offsets = [0, 64], sizes = [16, 448], strides = [1, 1]} : vector<16x512xf32> to vector<16x448xf32>
    %191 = vector.extract_strided_slice %156 {offsets = [0, 0], sizes = [16, 64], strides = [1, 1]} : vector<16x512xf32> to vector<16x64xf32>
    %192 = tpu.concatenate %190, %191 in 1 : vector<16x448xf32>, vector<16x64xf32> -> vector<16x512xf32>
    %193 = vector.extract_strided_slice %2 {offsets = [19, 0], sizes = [1, 512], strides = [1, 1]} : vector<25x512xf32> to vector<1x512xf32>
    %194 = vector.shape_cast %193 : vector<1x512xf32> to vector<512xf32>
    %195 = vector.shape_cast %194 : vector<512xf32> to vector<1x512xf32>
    %196 = vector.broadcast %195 : vector<1x512xf32> to vector<16x512xf32>
    %197 = arith.mulf %192, %196 : vector<16x512xf32>
    %198 = arith.addf %189, %197 : vector<16x512xf32>
    %199 = vector.extract_strided_slice %0 {offsets = [2, 0], sizes = [14, 512], strides = [1, 1]} : vector<16x512xf32> to vector<14x512xf32>
    %200 = vector.extract_strided_slice %0 {offsets = [0, 0], sizes = [2, 512], strides = [1, 1]} : vector<16x512xf32> to vector<2x512xf32>
    %201 = tpu.concatenate %199, %200 in 0 : vector<14x512xf32>, vector<2x512xf32> -> vector<16x512xf32>
    %c4 = arith.constant 4 : index
    %c0_14 = arith.constant 0 : index
    %c0_15 = arith.constant 0 : index
    %202 = vector.load %arg5[%c4, %c0_14, %c0_15] : memref<5x16x1xf32, #tpu.memory_space<vmem>>, vector<1x16x1xf32>
    %203 = vector.shape_cast %202 : vector<1x16x1xf32> to vector<16x1xf32>
    %204 = vector.broadcast %203 : vector<16x1xf32> to vector<16x512xf32>
    %205 = arith.mulf %201, %204 : vector<16x512xf32>
    %206 = vector.extract_strided_slice %205 {offsets = [0, 448], sizes = [16, 64], strides = [1, 1]} : vector<16x512xf32> to vector<16x64xf32>
    %207 = vector.extract_strided_slice %205 {offsets = [0, 0], sizes = [16, 448], strides = [1, 1]} : vector<16x512xf32> to vector<16x448xf32>
    %208 = tpu.concatenate %206, %207 in 1 : vector<16x64xf32>, vector<16x448xf32> -> vector<16x512xf32>
    %209 = vector.extract_strided_slice %2 {offsets = [20, 0], sizes = [1, 512], strides = [1, 1]} : vector<25x512xf32> to vector<1x512xf32>
    %210 = vector.shape_cast %209 : vector<1x512xf32> to vector<512xf32>
    %211 = vector.shape_cast %210 : vector<512xf32> to vector<1x512xf32>
    %212 = vector.broadcast %211 : vector<1x512xf32> to vector<16x512xf32>
    %213 = arith.mulf %208, %212 : vector<16x512xf32>
    %214 = arith.addf %198, %213 : vector<16x512xf32>
    %215 = vector.extract_strided_slice %205 {offsets = [0, 480], sizes = [16, 32], strides = [1, 1]} : vector<16x512xf32> to vector<16x32xf32>
    %216 = vector.extract_strided_slice %205 {offsets = [0, 0], sizes = [16, 480], strides = [1, 1]} : vector<16x512xf32> to vector<16x480xf32>
    %217 = tpu.concatenate %215, %216 in 1 : vector<16x32xf32>, vector<16x480xf32> -> vector<16x512xf32>
    %218 = vector.extract_strided_slice %2 {offsets = [21, 0], sizes = [1, 512], strides = [1, 1]} : vector<25x512xf32> to vector<1x512xf32>
    %219 = vector.shape_cast %218 : vector<1x512xf32> to vector<512xf32>
    %220 = vector.shape_cast %219 : vector<512xf32> to vector<1x512xf32>
    %221 = vector.broadcast %220 : vector<1x512xf32> to vector<16x512xf32>
    %222 = arith.mulf %217, %221 : vector<16x512xf32>
    %223 = arith.addf %214, %222 : vector<16x512xf32>
    %224 = vector.extract_strided_slice %2 {offsets = [22, 0], sizes = [1, 512], strides = [1, 1]} : vector<25x512xf32> to vector<1x512xf32>
    %225 = vector.shape_cast %224 : vector<1x512xf32> to vector<512xf32>
    %226 = vector.shape_cast %225 : vector<512xf32> to vector<1x512xf32>
    %227 = vector.broadcast %226 : vector<1x512xf32> to vector<16x512xf32>
    %228 = arith.mulf %205, %227 : vector<16x512xf32>
    %229 = arith.addf %223, %228 : vector<16x512xf32>
    %230 = vector.extract_strided_slice %205 {offsets = [0, 32], sizes = [16, 480], strides = [1, 1]} : vector<16x512xf32> to vector<16x480xf32>
    %231 = vector.extract_strided_slice %205 {offsets = [0, 0], sizes = [16, 32], strides = [1, 1]} : vector<16x512xf32> to vector<16x32xf32>
    %232 = tpu.concatenate %230, %231 in 1 : vector<16x480xf32>, vector<16x32xf32> -> vector<16x512xf32>
    %233 = vector.extract_strided_slice %2 {offsets = [23, 0], sizes = [1, 512], strides = [1, 1]} : vector<25x512xf32> to vector<1x512xf32>
    %234 = vector.shape_cast %233 : vector<1x512xf32> to vector<512xf32>
    %235 = vector.shape_cast %234 : vector<512xf32> to vector<1x512xf32>
    %236 = vector.broadcast %235 : vector<1x512xf32> to vector<16x512xf32>
    %237 = arith.mulf %232, %236 : vector<16x512xf32>
    %238 = arith.addf %229, %237 : vector<16x512xf32>
    %239 = vector.extract_strided_slice %205 {offsets = [0, 64], sizes = [16, 448], strides = [1, 1]} : vector<16x512xf32> to vector<16x448xf32>
    %240 = vector.extract_strided_slice %205 {offsets = [0, 0], sizes = [16, 64], strides = [1, 1]} : vector<16x512xf32> to vector<16x64xf32>
    %241 = tpu.concatenate %239, %240 in 1 : vector<16x448xf32>, vector<16x64xf32> -> vector<16x512xf32>
    %242 = vector.extract_strided_slice %2 {offsets = [24, 0], sizes = [1, 512], strides = [1, 1]} : vector<25x512xf32> to vector<1x512xf32>
    %243 = vector.shape_cast %242 : vector<1x512xf32> to vector<512xf32>
    %244 = vector.shape_cast %243 : vector<512xf32> to vector<1x512xf32>
    %245 = vector.broadcast %244 : vector<1x512xf32> to vector<16x512xf32>
    %246 = arith.mulf %241, %245 : vector<16x512xf32>
    %247 = arith.addf %238, %246 : vector<16x512xf32>
    %cst = arith.constant 5.000000e-01 : f32
    %248 = vector.broadcast %cst : f32 to vector<16x512xf32>
    %249 = arith.mulf %248, %247 : vector<16x512xf32>
    %cst_16 = arith.constant 0.707106769 : f32
    %250 = vector.broadcast %cst_16 : f32 to vector<16x512xf32>
    %251 = arith.mulf %247, %250 : vector<16x512xf32>
    %252 = math.erf %251 : vector<16x512xf32>
    %cst_17 = arith.constant 1.000000e+00 : f32
    %253 = vector.broadcast %cst_17 : f32 to vector<16x512xf32>
    %254 = arith.addf %253, %252 : vector<16x512xf32>
    %255 = arith.mulf %249, %254 : vector<16x512xf32>
    %256 = vector.extract_strided_slice %4 {offsets = [1, 0], sizes = [1, 512], strides = [1, 1]} : vector<3x512xf32> to vector<1x512xf32>
    %257 = vector.shape_cast %256 : vector<1x512xf32> to vector<512xf32>
    %258 = vector.shape_cast %257 : vector<512xf32> to vector<1x512xf32>
    %259 = vector.broadcast %258 : vector<1x512xf32> to vector<16x512xf32>
    %260 = arith.mulf %255, %259 : vector<16x512xf32>
    %261 = vector.extract_strided_slice %4 {offsets = [2, 0], sizes = [1, 512], strides = [1, 1]} : vector<3x512xf32> to vector<1x512xf32>
    %262 = vector.shape_cast %261 : vector<1x512xf32> to vector<512xf32>
    %263 = vector.shape_cast %262 : vector<512xf32> to vector<1x512xf32>
    %264 = vector.broadcast %263 : vector<1x512xf32> to vector<16x512xf32>
    %265 = arith.addf %260, %264 : vector<16x512xf32>
    %c0_18 = arith.constant 0 : index
    %c0_19 = arith.constant 0 : index
    %266 = vector.load %arg2[%c0_18, %c0_19] : memref<16x512xf32, #tpu.memory_space<vmem>>, vector<16x512xf32>
    %267 = arith.addf %266, %265 : vector<16x512xf32>
    %c0_20 = arith.constant 0 : index
    %c0_21 = arith.constant 0 : index
    %268 = vector.load %arg6[%c0_20, %c0_21] : memref<16x512xf32, #tpu.memory_space<vmem>>, vector<16x512xf32>
    tpu.vector_store %arg6[%c0_20, %c0_21], %267 {strides = array<i32>} : memref<16x512xf32, #tpu.memory_space<vmem>>, vector<16x512xf32>,
    return
  }
  func.func @transform_0(%arg0: i32) -> (i32, i32) {
    %c0_i32 = arith.constant 0 : i32
    %c0_i32_0 = arith.constant 0 : i32
    return %arg0, %c0_i32 : i32, i32
  }
  func.func @transform_1(%arg0: i32) -> (i32, i32) {
    %c0_i32 = arith.constant 0 : i32
    %c0_i32_0 = arith.constant 0 : i32
    return %arg0, %c0_i32 : i32, i32
  }
  func.func @transform_2(%arg0: i32) -> (i32, i32, i32) {
    %c0_i32 = arith.constant 0 : i32
    %c0_i32_0 = arith.constant 0 : i32
    %c0_i32_1 = arith.constant 0 : i32
    %c0_i32_2 = arith.constant 0 : i32
    return %c0_i32, %c0_i32_0, %c0_i32_1 : i32, i32, i32
  }
  func.func @transform_3(%arg0: i32) -> (i32, i32, i32) {
    %c0_i32 = arith.constant 0 : i32
    %c0_i32_0 = arith.constant 0 : i32
    %c0_i32_1 = arith.constant 0 : i32
    %c0_i32_2 = arith.constant 0 : i32
    return %c0_i32, %c0_i32_0, %c0_i32_1 : i32, i32, i32
  }
  func.func @transform_4(%arg0: i32) -> (i32, i32, i32) {
    %c0_i32 = arith.constant 0 : i32
    %c0_i32_0 = arith.constant 0 : i32
    %c0_i32_1 = arith.constant 0 : i32
    %c0_i32_2 = arith.constant 0 : i32
    return %c0_i32, %c0_i32_0, %c0_i32_1 : i32, i32, i32
  }
  func.func @transform_5(%arg0: i32) -> (i32, i32) {
    %c0_i32 = arith.constant 0 : i32
    %c0_i32_0 = arith.constant 0 : i32
    return %arg0, %c0_i32 : i32, i32
  }
}

</mosaic_0001>

<bundles_post_ra>
// kernel: tpu_custom_call.1
= control target key start
LH: loop header
LB: loop body
LE: loop exit
PB: predicated region body
PF: predicated region fallthrough
CT: control target
= control target key end

     0   :  { %6 = vsyncpa [#allocation3], 0  ;;  %s151_s0 = inlined_call_operand.hbm [shape: f32[16,256], index: 0, kind: input, shape index: {}]   ;;  %s152_s1 = inlined_call_operand.hbm [shape: f32[16,256], index: 1, kind: output, shape index: {}]  }
   0x1   :  { %7 = vsyncpa [#allocation4], 0  ;;  %s12_s8 = sshll.u32 %s151_s0, 4  ;;  %s124_s9 = smov [#allocation2]   ;;  %s13_s8 = int_to_ptr.hbm [resolvable:$true] %s12_s8 }
   0x2   :  { %s14_s10 = sshll.u32 %s124_s9, 4  ;;  %s125_s11 = smov 256   ;;  %s15_s10 = int_to_ptr.vmem [resolvable:$true] %s14_s10 }
   0x3   :  { %s126_s12 = smov 16  }
   0x4   :  { %20 = dma.hbm_to_vmem [thread:$0]  %s13_s8, 512, %s15_s10, [#allocation3], %s125_s11, %s125_s11, %s126_s12  }
   0x5   :  { %120 = dma.done.wait [#allocation3], 512  }
   0x6   :  { %121 = vsyncadd [#allocation3], 4294966784  ;;  %v26_v0 = vld [vmem:[#allocation2 + $0x8] sm:$0xff]  ;;  %v25_v1 = vld [vmem:[#allocation2] sm:$0xff]  ;;  %s127_s13 = smov 1   ;;  %v37_v4 = vlaneseq  ;;  %s128_s0 = smov [#allocation5]  }
   0x7   :  { %33 = vrot.lane.b32.xlu1 %v26_v0, %s127_s13  ;;  %29 = vrot.lane.b32.xlu0 %v25_v1, %s127_s13  ;;  %v28_v2 = vld [vmem:[#allocation2 + $0x18] sm:$0xff]  ;;  %v27_v3 = vld [vmem:[#allocation2 + $0x10] sm:$0xff]  ;;  %s52_s14 = sshll.u32 %s128_s0, 4  ;;  %s54_s17 = sshll.u32 %s152_s1, 4  ;;  %s53_s14 = int_to_ptr.vmem [resolvable:$true] %s52_s14  ;;  %s55_s17 = int_to_ptr.hbm [resolvable:$true] %s54_s17 }
   0x8   :  { %v38_v5 = vand.u32 127, %v37_v4 }
   0xa   :  { %vm39_vm0 = vcmp.lt.s32.totalorder %v38_v5, 1 }
   0xf   :  { %35 = vrot.lane.b32.xlu1 %v28_v2, %s127_s13  ;;  %31 = vrot.lane.b32.xlu0 %v27_v3, %s127_s13 }
  0x79   :  { %v34_v6 = vpop.permute.xlu1 %33  ;;  %v30_v7 = vpop.permute.xlu0 %29 }
  0x7a   :  { %v40_v8 = vsel %vm39_vm0, %v30_v7, %v34_v6  ;;  %v42_v9 = vsel %vm39_vm0, %v34_v6, %v30_v7 }
  0x7b   :  { %44 = vst [vmem:[#allocation5] sm:$0xff] %v42_v9 }
  0x7c   :  { %45 = vst [vmem:[#allocation5 + $0x8] sm:$0xff] %v40_v8 }
  0x81   :  { %v36_v10 = vpop.permute.xlu1 %35  ;;  %v32_v11 = vpop.permute.xlu0 %31 }
  0x82   :  { %v41_v12 = vsel %vm39_vm0, %v32_v11, %v36_v10  ;;  %v43_v13 = vsel %vm39_vm0, %v36_v10, %v32_v11 }
  0x83   :  { %46 = vst [vmem:[#allocation5 + $0x10] sm:$0xff] %v43_v13 }
  0x84   :  { %47 = vst [vmem:[#allocation5 + $0x18] sm:$0xff] %v41_v12 }
  0x85   :  { %60 = dma.vmem_to_hbm [thread:$0]  %s53_s14, 512, %s55_s17, [#allocation4], %s125_s11, %s125_s11, %s126_s12  }
  0x86   :  { %122 = dma.done.wait [#allocation4], 512  }
  0x87   :  { %123 = vsyncadd [#allocation4], 4294966784 }
  0x88   :  { %65 = vsyncpa [#allocation3], 1 }
  0x89   :  { %66 = vsyncpa [#allocation4], 1 }

// kernel: tpu_custom_call.1
= control target key start
LH: loop header
LB: loop body
LE: loop exit
PB: predicated region body
PF: predicated region fallthrough
CT: control target
= control target key end

     0   :  { %6 = vsyncpa [#allocation3], 0  ;;  %s145_s0 = inlined_call_operand.hbm [shape: f32[16,256], index: 0, kind: input, shape index: {}]   ;;  %s146_s1 = inlined_call_operand.hbm [shape: f32[16,256], index: 1, kind: output, shape index: {}]  }
   0x1   :  { %7 = vsyncpa [#allocation4], 0  ;;  %s12_s8 = sshll.u32 %s145_s0, 4  ;;  %s119_s9 = smov [#allocation2]   ;;  %s13_s8 = int_to_ptr.hbm [resolvable:$true] %s12_s8 }
   0x2   :  { %s14_s10 = sshll.u32 %s119_s9, 4  ;;  %s120_s11 = smov 256   ;;  %s15_s10 = int_to_ptr.vmem [resolvable:$true] %s14_s10 }
   0x3   :  { %s121_s12 = smov 16  }
   0x4   :  { %20 = dma.hbm_to_vmem [thread:$0]  %s13_s8, 512, %s15_s10, [#allocation3], %s120_s11, %s120_s11, %s121_s12  }
   0x5   :  { %115 = dma.done.wait [#allocation3], 512  }
   0x6   :  { %116 = vsyncadd [#allocation3], 4294966784  ;;  %v33_v0 = vlaneseq  ;;  %v25_v2 = vld [vmem:[#allocation2] sm:$0xff]  ;;  %v27_v3 = vld [vmem:[#allocation2 + $0x10] sm:$0xff]  ;;  %s122_s0 = smov [#allocation5]   ;;  %s50_s16 = sshll.u32 %s146_s1, 4  ;;  %s51_s16 = int_to_ptr.hbm [resolvable:$true] %s50_s16 }
   0x7   :  { %v26_v4 = vld [vmem:[#allocation2 + $0x8] sm:$0xff]  ;;  %v29_v5 = vrot.slane %v25_v2, 7  ;;  %v31_v6 = vrot.slane %v27_v3, 7  ;;  %v28_v7 = vld [vmem:[#allocation2 + $0x18] sm:$0xff]  ;;  %s48_s13 = sshll.u32 %s122_s0, 4  ;;  %s49_s13 = int_to_ptr.vmem [resolvable:$true] %s48_s13 }
   0x8   :  { %v34_v1 = vshrl.u32 %v33_v0, 7  ;;  %v30_v8 = vrot.slane %v26_v4, 7  ;;  %v32_v9 = vrot.slane %v28_v7, 7 }
   0xa   :  { %vm35_vm0 = vcmp.lt.s32.totalorder %v34_v1, 1 }
   0xb   :  { %v38_v10 = vsel %vm35_vm0, %v31_v6, %v29_v5  ;;  %v36_v11 = vsel %vm35_vm0, %v29_v5, %v31_v6  ;;  %v39_v12 = vsel %vm35_vm0, %v32_v9, %v30_v8  ;;  %v37_v13 = vsel %vm35_vm0, %v30_v8, %v32_v9 }
   0xc   :  { %40 = vst [vmem:[#allocation5] sm:$0xff] %v38_v10 }
   0xd   :  { %41 = vst [vmem:[#allocation5 + $0x8] sm:$0xff] %v39_v12 }
   0xe   :  { %42 = vst [vmem:[#allocation5 + $0x10] sm:$0xff] %v36_v11 }
   0xf   :  { %43 = vst [vmem:[#allocation5 + $0x18] sm:$0xff] %v37_v13 }
  0x10   :  { %56 = dma.vmem_to_hbm [thread:$0]  %s49_s13, 512, %s51_s16, [#allocation4], %s120_s11, %s120_s11, %s121_s12  }
  0x11   :  { %117 = dma.done.wait [#allocation4], 512  }
  0x12   :  { %118 = vsyncadd [#allocation4], 4294966784 }
  0x13   :  { %61 = vsyncpa [#allocation3], 1 }
  0x14   :  { %62 = vsyncpa [#allocation4], 1 }

// kernel: tile.44
= control target key start
LH: loop header
LB: loop body
LE: loop exit
PB: predicated region body
PF: predicated region fallthrough
CT: control target
= control target key end

     0   :  { %s56_s8 = smov 96   ;;  %s57_s11 = smov 32   ;;  %vm3_vm0 = vcmask 261120   ;;  %vm9_vm1 = vcmask 1048320   ;;  %vm15_vm2 = vcmask 785920   ;;  %vm21_vm3 = vcmask 523520   ;;  %s93_s0 = inlined_call_operand.vmem [shape: f32[16,32], index: 0, kind: input, shape index: {}]   ;;  %s94_s1 = inlined_call_operand.vmem [shape: f32[1,512], index: 1, kind: output, shape index: {}]  }
   0x1   :  { %v47_v0 = vld [vmem:[%s93_s0 + $0x3] ss:$4 sm:$0xf]   ;;  %v49_v1 = vld [vmem:[%s93_s0 + $0x1] ss:$4 sm:$0xf]  }
   0x2   :  { %7 = vrot.lane.b32.xlu0 %v47_v0, %s56_s8  ;;  %19 = vrot.lane.b32.xlu1 %v49_v1, %s57_s11  ;;  %v48_v2 = vld [vmem:[%s93_s0 + $0x2] ss:$4 sm:$0xf]   ;;  %s58_s14 = smov 64  }
   0x3   :  { %v2_v3 = vld [vmem:[%s93_s0] ss:$4 sm:$0xf]  }
   0x4   :  { %4 = vst.msk [vmem:[#allocation0] ss:$8 sm:$0xf] %vm3_vm0, %v2_v3  }
   0xa   :  { %13 = vrot.lane.b32.xlu0 %v48_v2, %s58_s14 }
  0x74   :  { %v8_v4 = vpop.permute.xlu0 %7   ;;  %v20_v5 = vpop.permute.xlu1 %19  }
  0x75   :  { %10 = vst.msk [vmem:[#allocation0] ss:$8 sm:$0xf] %vm9_vm1, %v8_v4  }
  0x7c   :  { %v14_v6 = vpop.permute.xlu0 %13  }
  0x7d   :  { %16 = vst.msk [vmem:[#allocation0] ss:$8 sm:$0xf] %vm15_vm2, %v14_v6  }
  0x7e   :  { %22 = vst.msk [vmem:[#allocation0] ss:$8 sm:$0xf] %vm21_vm3, %v20_v5  }
  0x85   :  { %v25_v7 = vld [vmem:[#allocation0] sm:$0x1]  ;;  %v30_v8 = vld [vmem:[#allocation0 + $0x8] sm:$0x1]  ;;  %v36_v9 = vld [vmem:[#allocation0 + $0x10] sm:$0x1] }
  0x86   :  { %28 = vst [vmem:[%s94_s1] sm:$0x1] %v25_v7  ;;  %v42_v10 = vld [vmem:[#allocation0 + $0x18] sm:$0x1] }
  0x87   :  { %50 = vst [vmem:[%s94_s1 + $0x1] sm:$0x1] %v30_v8 }
  0x88   :  { %51 = vst [vmem:[%s94_s1 + $0x2] sm:$0x1] %v36_v9 }
  0x89   :  { %52 = vst [vmem:[%s94_s1 + $0x3] sm:$0x1] %v42_v10 }

// kernel: tile.35
= control target key start
LH: loop header
LB: loop body
LE: loop exit
PB: predicated region body
PF: predicated region fallthrough
CT: control target
= control target key end

     0   :  { %s28_s0 = inlined_call_operand.vmem [shape: f32[32], index: 0, kind: input, shape index: {}]   ;;  %s29_s1 = inlined_call_operand.vmem [shape: f32[16,32], index: 1, kind: output, shape index: {}]  }
   0x1   :  { %v4_v0 = vld [vmem:[%s28_s0] ss:$0 sm:$0xff] }
   0x2   :  { %5 = vst [vmem:[%s29_s1] sm:$0xff] %v4_v0 }
   0x3   :  { %8 = vst [vmem:[%s29_s1 + $0x8] sm:$0xff] %v4_v0 }

// kernel: _fold_block_forward.1
= control target key start
LH: loop header
LB: loop body
LE: loop exit
PB: predicated region body
PF: predicated region fallthrough
CT: control target
= control target key end

     0   :  { %s2156_s18 = smov 0   ;;  %s3823_s0 = inlined_call_operand.vmem [shape: f32[32,512], index: 0, kind: input, shape index: {}]   ;;  %s3824_s1 = inlined_call_operand.vmem [shape: f32[32,512], index: 1, kind: input, shape index: {}, may-alias: {1,5}]   ;;  %s3825_s2 = inlined_call_operand.vmem [shape: f32[1,25,512], index: 2, kind: input, shape index: {}]   ;;  %s3826_s3 = inlined_call_operand.vmem [shape: f32[1,3,512], index: 3, kind: input, shape index: {}]   ;;  %s3827_s4 = inlined_call_operand.vmem [shape: f32[5,16,1], index: 4, kind: input, shape index: {}]   ;;  %s3828_s5 = inlined_call_operand.vmem [shape: f32[32,512], index: 5, kind: output, shape index: {}, may-alias: {1,5}]  }
   0x1 LB: > { %s2036_s19 = sadd.s32 4294967295, %s2120_s18   ;;  %p2040_p0 = scmp.ge.s32.totalorder %s2120_s18, 1  ;;  %s2120_s18 = sphi %s2156_s18, %s15_s18  }
   0x2   : > { %p201_p1 = scmp.lt.s32.totalorder %s2120_s18, 3 }
   0x4   : > { %p202_p2 = pnand %p2040_p0, %p201_p1 }
   0x6   : > { %205 = sbr.rel (%p202_p2) target bundleno = 851 (0x353), region = 40 }
   0xb   : > { %v335_v0 = vld [vmem:[%s3827_s4] sm:$0xff]  ;;  %v2122_v1 = vmov 0   ;;  %v2050_v2 = vld [vmem:[%s3827_s4 + $0x10] sm:$0xff]  ;;  %v336_v3 = vld [vmem:[%s3827_s4 + $0x8] sm:$0xff]  ;;  %s2041_s28 = sshll.u32 %s2036_s19, 1  ;;  %vm314_vm0 = vcmask 1041408  }
   0xc   : > { %2081 = vset.pattern.permute.xlu0 %v2122_v1  ;;  %2082 = vset.pattern.permute.xlu2 %v2122_v1  ;;  %v2051_v4 = vld [vmem:[%s3827_s4 + $0x18] sm:$0xff]  ;;  %p238_p3 = scmp.lt.s32.totalorder %s2041_s28, 3  ;;  %s2123_s8 = smov 64   ;;  %vm576_vm1 = vcmask 1040384   ;;  %vm381_vm2 = vcmask 523264   ;;  %vm436_vm3 = vcmask 261120  }
   0xd   : > { %339 = vperm.xlu0 %2081, %v335_v0   ;;  %602 = vperm.xlu2 %2082, %v2050_v2   ;;  %s2124_s9 = smov 32   ;;  %s2125_s10 = smov 96   ;;  %vm509_vm4 = vcmask 785408   ;;  %vm1030_vm5 = vcmask 1046528   ;;  %vm1290_vm6 = vcmask 1045504  }
   0xe   : > { %2083 = vset.pattern.permute.xlu1 %v2122_v1  ;;  %s3857_s28 = smov (!%p238_p3, %s2041_s28), 3 }
   0xf   : > { %s2176_s29 = sshll.u32 %s3857_s28, 5 }
  0x10   : > { %s2182_s7 = scalar_lea.vmem %s3823_s0, %s2176_s29  ;;  %s3652_s19 = scalar_lea.vmem %s3824_s1, %s2176_s29 }
  0x11   : > { %v2185_v5 = vld [vmem:[%s2182_s7] sm:$0xff]  ;;  %v2188_v6 = vld [vmem:[%s2182_s7 + $0x10] sm:$0xff]  ;;  %v2191_v7 = vld [vmem:[%s2182_s7 + $0x18] sm:$0xff]  ;;  %s3681_s22 = scalar_lea.vmem %s3828_s5, %s2176_s29 }
  0x12   : > { %v2194_v8 = vld [vmem:[%s2182_s7 + $0x20] sm:$0xff]  ;;  %v2197_v9 = vld [vmem:[%s2182_s7 + $0x30] sm:$0xff]  ;;  %v2200_v10 = vld [vmem:[%s2182_s7 + $0x38] sm:$0xff]  ;;  %v315_v11 = vrot.slane %v2185_v5, 6  ;;  %v317_v12 = vrot.slane %v2188_v6, 6  ;;  %v318_v16 = vrot.slane %v2191_v7, 6 }
  0x13   : > { %v302_v13 = vrot.slane %v2194_v8, 6  ;;  %v304_v14 = vrot.slane %v2197_v9, 6  ;;  %v305_v15 = vrot.slane %v2200_v10, 6  ;;  %v2212_v21 = vld [vmem:[%s2182_s7 + $0x8] sm:$0xff]  ;;  %v568_v39 = vrot.slane %v2194_v8, 7 }
  0x14   : > { %v2215_v22 = vld [vmem:[%s2182_s7 + $0x28] sm:$0xff]  ;;  %v316_v27 = vrot.slane %v2212_v21, 6  ;;  %v577_v40 = vrot.slane %v2185_v5, 7  ;;  %v571_v44 = vrot.slane %v2200_v10, 7  ;;  %v580_v45 = vrot.slane %v2191_v7, 7 }
  0x15   : > { %344 = vperm.xlu0 %2081, %v336_v3   ;;  %v331_v17 = vsel %vm314_vm0, %v302_v13, %v315_v11  ;;  %v333_v18 = vsel %vm314_vm0, %v304_v14, %v317_v12  ;;  %v334_v19 = vsel %vm314_vm0, %v305_v15, %v318_v16  ;;  %v303_v26 = vrot.slane %v2215_v22, 6 }
  0x16   : > { %v321_v28 = vsel %vm314_vm0, %v317_v12, %v304_v14  ;;  %v322_v29 = vsel %vm314_vm0, %v318_v16, %v305_v15  ;;  %v319_v35 = vsel %vm314_vm0, %v315_v11, %v302_v13  ;;  %v593_v42 = vsel %vm576_vm1, %v568_v39, %v577_v40 }
  0x17   : > { %v332_v30 = vsel %vm314_vm0, %v303_v26, %v316_v27  ;;  %v320_v36 = vsel %vm314_vm0, %v316_v27, %v303_v26  ;;  %v581_v47 = vsel %vm576_vm1, %v577_v40, %v568_v39  ;;  %v584_v48 = vsel %vm576_vm1, %v580_v45, %v571_v44  ;;  %v283_v27 = vld [vmem:[%s3826_s3 + $0x8] sm:$0x77] }
  0x18   : > { %v570_v51 = vrot.slane %v2197_v9, 7  ;;  %v579_v52 = vrot.slane %v2188_v6, 7  ;;  %v596_v53 = vsel %vm576_vm1, %v571_v44, %v580_v45  ;;  %v569_v57 = vrot.slane %v2215_v22, 7 }
  0x19   : > { %v578_v58 = vrot.slane %v2212_v21, 7 }
  0x1a   : > { %v595_v54 = vsel %vm576_vm1, %v570_v51, %v579_v52  ;;  %v583_v60 = vsel %vm576_vm1, %v579_v52, %v570_v51 }
  0x1b   : > { %v594_v59 = vsel %vm576_vm1, %v569_v57, %v578_v58  ;;  %v582_v63 = vsel %vm576_vm1, %v578_v58, %v569_v57 }
  0x1d   : > { %607 = vperm.xlu0 %2081, %v2051_v4  }
  0x67   : > { %v603_v41 = vpop.permute.xlu2 %602 }
  0x68   : > { %v2285_v43 = vmul.f32 %v603_v41, %v593_v42  ;;  %v2311_v55 = vmul.f32 %v603_v41, %v596_v53  ;;  %v2313_v56 = vmul.f32 %v603_v41, %v595_v54  ;;  %v2325_v61 = vmul.f32 %v603_v41, %v594_v59 }
  0x6a   : > { %3838 = vst [vmem:[#allocation4_spill] sm:$0xff] %v2311_v55 }
  0x6b   : > { %3839 = vst [vmem:[#allocation5_spill] sm:$0xff] %v2313_v56 }
  0x6c   : > { %3840 = vst [vmem:[#allocation6_spill] sm:$0xff] %v2325_v61 }
  0x7f   : > { %v340_v20 = vpop.permute.xlu0 %339 }
  0x80   : > { %v2217_v23 = vmul.f32 %v340_v20, %v331_v17  ;;  %v2219_v24 = vmul.f32 %v340_v20, %v333_v18  ;;  %v2221_v25 = vmul.f32 %v340_v20, %v334_v19  ;;  %v2238_v34 = vmul.f32 %v340_v20, %v332_v30 }
  0x82   : > { %357 = vrot.lane.b32.xlu1 %v2221_v25, %s2123_s8  ;;  %373 = vrot.lane.b32.xlu0 %v2219_v24, %s2123_s8 }
  0x83   : > { %369 = vrot.lane.b32.xlu2 %v2217_v23, %s2123_s8 }
  0x87   : > { %v345_v31 = vpop.permute.xlu0 %344 }
  0x88   : > { %v2234_v32 = vmul.f32 %v345_v31, %v321_v28  ;;  %v2236_v33 = vmul.f32 %v345_v31, %v322_v29  ;;  %v2248_v37 = vmul.f32 %v345_v31, %v319_v35  ;;  %v2250_v38 = vmul.f32 %v345_v31, %v320_v36  ;;  %v2394_v28 = vld [vmem:[%s3825_s2 + $0x18] sm:$0xff]  ;;  %v2404_v31 = vld [vmem:[%s3825_s2] sm:$0xff] }
  0x89   : > { %v289_v29 = vperm.slane %v283_v27, 4  ;;  %v401_v30 = vperm.slane %v2394_v28, 0  ;;  %v282_v35 = vld [vmem:[%s3826_s3] sm:$0x77]  ;;  %v456_v39 = vperm.slane %v2394_v28, 1  ;;  %v398_v41 = vperm.slane %v2404_v31, 0 }
  0x8a   : > { %359 = vrot.lane.b32.xlu1 %v2236_v33, %s2123_s8  ;;  %379 = vrot.lane.b32.xlu0 %v2234_v32, %s2123_s8  ;;  %v286_v40 = vperm.slane %v282_v35, 0  ;;  %v476_v54 = vperm.slane %v2394_v28, 2 }
  0x8b   : > { %371 = vrot.lane.b32.xlu2 %v2238_v34, %s2123_s8  ;;  %v297_v45 = vperm.slane %v289_v29, 0 }
  0x8c   : > { %v294_v57 = vperm.slane %v286_v40, 0 }
  0x8f   : > { %v608_v46 = vpop.permute.xlu0 %607 }
  0x90   : > { %v2297_v49 = vmul.f32 %v608_v46, %v581_v47  ;;  %v2299_v50 = vmul.f32 %v608_v46, %v584_v48  ;;  %v2327_v62 = vmul.f32 %v608_v46, %v583_v60  ;;  %v2336_v0 = vmul.f32 %v608_v46, %v582_v63 }
  0x91   : > { %v484_v63 = vmul.f32 %v476_v54, %v2236_v33 }
  0x92   : > { %424 = vrot.lane.b32.xlu0 %v2217_v23, %s2124_s9  ;;  %375 = vrot.lane.b32.xlu1 %v2248_v37, %s2123_s8  ;;  %3836 = vst [vmem:[#allocation2_spill] sm:$0xff] %v2297_v49 }
  0x93   : > { %377 = vrot.lane.b32.xlu2 %v2250_v38, %s2123_s8  ;;  %3837 = vst [vmem:[#allocation3_spill] sm:$0xff] %v2299_v50 }
  0x94   : > { %3841 = vst [vmem:[#allocation7_spill] sm:$0xff] %v2327_v62 }
  0x95   : > { %3842 = vst [vmem:[#allocation8_spill] sm:$0xff] %v2336_v0 }
  0x9a   : > { %430 = vrot.lane.b32.xlu0 %v2248_v37, %s2124_s9  ;;  %418 = vrot.lane.b32.xlu1 %v2221_v25, %s2124_s9 }
  0x9b   : > { %420 = vrot.lane.b32.xlu2 %v2236_v33, %s2124_s9 }
  0xa2   : > { %493 = vrot.lane.b32.xlu0 %v2217_v23, %s2125_s10  ;;  %426 = vrot.lane.b32.xlu1 %v2238_v34, %s2124_s9 }
  0xa3   : > { %428 = vrot.lane.b32.xlu2 %v2219_v24, %s2124_s9 }
  0xaa   : > { %499 = vrot.lane.b32.xlu0 %v2221_v25, %s2125_s10  ;;  %432 = vrot.lane.b32.xlu1 %v2250_v38, %s2124_s9 }
  0xab   : > { %434 = vrot.lane.b32.xlu2 %v2234_v32, %s2124_s9 }
  0xb2   : > { %505 = vrot.lane.b32.xlu0 %v2234_v32, %s2125_s10  ;;  %495 = vrot.lane.b32.xlu1 %v2238_v34, %s2125_s10 }
  0xb3   : > { %497 = vrot.lane.b32.xlu2 %v2219_v24, %s2125_s10 }
  0xba   : > { %632 = vrot.lane.b32.xlu0 %v2285_v43, %s2123_s8  ;;  %501 = vrot.lane.b32.xlu1 %v2248_v37, %s2125_s10 }
  0xbb   : > { %503 = vrot.lane.b32.xlu2 %v2250_v38, %s2125_s10 }
  0xc2   : > { %638 = vrot.lane.b32.xlu0 %v2297_v49, %s2123_s8  ;;  %507 = vrot.lane.b32.xlu1 %v2236_v33, %s2125_s10  ;;  %v2445_v33 = vld [vmem:[%s3825_s2 + $0x10] sm:$0xff] }
  0xc3   : > { %622 = vrot.lane.b32.xlu2 %v2299_v50, %s2123_s8 }
  0xca   : > { %680 = vrot.lane.b32.xlu0 %v2311_v55, %s2124_s9  ;;  %620 = vrot.lane.b32.xlu1 %v2311_v55, %s2123_s8 }
  0xcb   : > { %636 = vrot.lane.b32.xlu2 %v2313_v56, %s2123_s8 }
  0xd2   : > { %688 = vrot.lane.b32.xlu0 %v2325_v61, %s2124_s9  ;;  %634 = vrot.lane.b32.xlu1 %v2325_v61, %s2123_s8 }
  0xd3   : > { %642 = vrot.lane.b32.xlu2 %v2327_v62, %s2123_s8 }
  0xda   : > { %694 = vrot.lane.b32.xlu0 %v2336_v0, %s2124_s9  ;;  %640 = vrot.lane.b32.xlu1 %v2336_v0, %s2123_s8 }
  0xdb   : > { %686 = vrot.lane.b32.xlu2 %v2285_v43, %s2124_s9 }
  0xdd   : > { %v370_v1 = vpop.permute.xlu2 %369 }
  0xe2   : > { %756 = vrot.lane.b32.xlu0 %v2325_v61, %s2125_s10  ;;  %682 = vrot.lane.b32.xlu1 %v2299_v50, %s2124_s9 }
  0xe3   : > { %692 = vrot.lane.b32.xlu2 %v2297_v49, %s2124_s9 }
  0xe5   : > { %v372_v2 = vpop.permute.xlu2 %371 }
  0xe6   : > { %v2351_v3 = vsel %vm381_vm2, %v370_v1, %v372_v2 }
  0xea   : > { %762 = vrot.lane.b32.xlu0 %v2297_v49, %s2125_s10  ;;  %690 = vrot.lane.b32.xlu1 %v2313_v56, %s2124_s9 }
  0xeb   : > { %754 = vrot.lane.b32.xlu2 %v2285_v43, %s2125_s10 }
  0xed   : > { %v378_v4 = vpop.permute.xlu2 %377 }
  0xf2   : > { %768 = vrot.lane.b32.xlu0 %v2299_v50, %s2125_s10  ;;  %696 = vrot.lane.b32.xlu1 %v2327_v62, %s2124_s9 }
  0xf3   : > { %760 = vrot.lane.b32.xlu2 %v2311_v55, %s2125_s10 }
  0xf4   : > { %v358_v11 = vpop.permute.xlu1 %357  ;;  %v374_v12 = vpop.permute.xlu0 %373 }
  0xf5   : > { %v2366_v13 = vsel %vm381_vm2, %v358_v11, %v370_v1  ;;  %v2369_v14 = vsel %vm381_vm2, %v372_v2, %v374_v12  ;;  %v2372_v15 = vsel %vm381_vm2, %v374_v12, %v358_v11  ;;  %v421_v16 = vpop.permute.xlu2 %420  ;;  %v2433_v1 = vld [vmem:[%s3825_s2 + $0x8] sm:$0xff]  ;;  %v473_v12 = vperm.slane %v2404_v31, 2 }
  0xf6   : > { %v402_v58 = vmul.f32 %v398_v41, %v2366_v13  ;;  %v405_v59 = vmul.f32 %v401_v30, %v2372_v15  ;;  %v399_v11 = vperm.slane %v2433_v1, 0 }
  0xf7   : > { %v477_v49 = vmul.f32 %v473_v12, %v2217_v23  ;;  %v455_v23 = vperm.slane %v2445_v33, 1 }
  0xf8   : > { %v410_v29 = vadd.f32 %v402_v58, %v294_v57 }
  0xfa   : > { %834 = vrot.lane.b32.xlu0 %v2185_v5, %s2123_s8  ;;  %758 = vrot.lane.b32.xlu1 %v2313_v56, %s2125_s10 }
  0xfb   : > { %766 = vrot.lane.b32.xlu2 %v2327_v62, %s2125_s10  ;;  %v403_v62 = vmul.f32 %v399_v11, %v2351_v3 }
  0xfc   : > { %v360_v17 = vpop.permute.xlu1 %359  ;;  %v380_v18 = vpop.permute.xlu0 %379 }
  0xfd   : > { %v2381_v19 = vsel %vm381_vm2, %v378_v4, %v380_v18  ;;  %v2384_v20 = vsel %vm381_vm2, %v380_v18, %v360_v17  ;;  %v2386_v26 = vpop.permute.xlu2 %428  ;;  %v287_v18 = vperm.slane %v282_v35, 4 }
  0xfe   : > { %v409_v36 = vmul.f32 %v401_v30, %v2384_v20  ;;  %v288_v30 = vperm.slane %v283_v27, 0 }
 0x100   : > { %v417_v52 = vadd.f32 %v409_v36, %v297_v45  ;;  %v400_v36 = vperm.slane %v2445_v33, 0  ;;  %v296_v55 = vperm.slane %v288_v30, 0 }
 0x102   : > { %840 = vrot.lane.b32.xlu0 %v2194_v8, %s2123_s8  ;;  %764 = vrot.lane.b32.xlu1 %v2336_v0, %s2125_s10  ;;  %v480_v0 = vmul.f32 %v476_v54, %v2221_v25  ;;  %v404_v61 = vmul.f32 %v400_v36, %v2369_v14  ;;  %v475_v54 = vperm.slane %v2445_v33, 2 }
 0x103   : > { %830 = vrot.lane.b32.xlu2 %v2200_v10, %s2123_s8 }
 0x104   : > { %v2414_v42 = vpop.permute.xlu0 %424  ;;  %v376_v44 = vpop.permute.xlu1 %375 }
 0x105   : > { %v2416_v46 = vpop.permute.xlu2 %434  ;;  %v2419_v47 = vsel %vm381_vm2, %v376_v44, %v378_v4  ;;  %v2422_v48 = vsel %vm381_vm2, %v360_v17, %v376_v44  ;;  %v453_v4 = vperm.slane %v2404_v31, 1  ;;  %v413_v44 = vadd.f32 %v405_v59, %v297_v45 }
 0x106   : > { %v442_v51 = vsel %vm436_vm3, %v2416_v46, %v421_v16  ;;  %v406_v2 = vmul.f32 %v398_v41, %v2422_v48  ;;  %v481_v45 = vmul.f32 %v473_v12, %v2248_v37  ;;  %v295_v59 = vperm.slane %v287_v18, 0 }
 0x107   : > { %v464_v53 = vmul.f32 %v456_v39, %v442_v51 }
 0x108   : > { %v414_v35 = vadd.f32 %v406_v2, %v294_v57  ;;  %v454_v57 = vperm.slane %v2433_v1, 1  ;;  %v474_v2 = vperm.slane %v2433_v1, 2 }
 0x109   : > { %v472_v60 = vadd.f32 %v464_v53, %v417_v52 }
 0x10a   : > { %882 = vrot.lane.b32.xlu0 %v2191_v7, %s2124_s9  ;;  %828 = vrot.lane.b32.xlu1 %v2191_v7, %s2123_s8 }
 0x10b   : > { %838 = vrot.lane.b32.xlu2 %v2188_v6, %s2123_s8  ;;  %v2450_v17 = vadd.f32 %v484_v63, %v472_v60 }
 0x10c   : > { %v2453_v40 = vpop.permute.xlu0 %430  ;;  %v419_v41 = vpop.permute.xlu1 %418 }
 0x10d   : > { %v2455_v51 = vpop.permute.xlu2 %497  ;;  %v452_v52 = vsel %vm436_vm3, %v421_v16, %v2453_v40  ;;  %v439_v53 = vsel %vm436_vm3, %v2386_v26, %v419_v41  ;;  %v451_v60 = vsel %vm436_vm3, %v419_v41, %v2414_v42  ;;  %v479_v41 = vmul.f32 %v475_v54, %v2219_v24 }
 0x10e   : > { %v461_v58 = vmul.f32 %v453_v4, %v452_v52  ;;  %v457_v27 = vmul.f32 %v453_v4, %v451_v60  ;;  %v460_v63 = vmul.f32 %v456_v39, %v439_v53  ;;  %v408_v52 = vmul.f32 %v400_v36, %v2381_v19 }
 0x10f   : > { %v407_v53 = vmul.f32 %v399_v11, %v2419_v47 }
 0x110   : > { %v469_v56 = vadd.f32 %v461_v58, %v414_v35  ;;  %v465_v50 = vadd.f32 %v457_v27, %v410_v29  ;;  %v468_v16 = vadd.f32 %v460_v63, %v413_v44  ;;  %v478_v44 = vmul.f32 %v474_v2, %v2238_v34 }
 0x111   : > { %v551_v34 = vperm.slane %v2394_v28, 4  ;;  %v416_v11 = vadd.f32 %v408_v52, %v296_v55  ;;  %v415_v36 = vadd.f32 %v407_v53, %v295_v59  ;;  %v529_v53 = vperm.slane %v2433_v1, 3 }
 0x112   : > { %890 = vrot.lane.b32.xlu0 %v2212_v21, %s2124_s9  ;;  %836 = vrot.lane.b32.xlu1 %v2212_v21, %s2123_s8  ;;  %v488_v25 = vadd.f32 %v480_v0, %v468_v16  ;;  %v2474_v37 = vadd.f32 %v477_v49, %v465_v50  ;;  %v2476_v39 = vadd.f32 %v481_v45, %v469_v56 }
 0x113   : > { %844 = vrot.lane.b32.xlu2 %v2197_v9, %s2123_s8  ;;  %v411_v50 = vadd.f32 %v403_v62, %v295_v59  ;;  %v412_v56 = vadd.f32 %v404_v61, %v296_v55  ;;  %v530_v61 = vperm.slane %v2445_v33, 3  ;;  %v531_v62 = vperm.slane %v2394_v28, 3 }
 0x114   : > { %v494_v4 = vpop.permute.xlu0 %493  ;;  %v427_v12 = vpop.permute.xlu1 %426 }
 0x115   : > { %v2482_v18 = vpop.permute.xlu2 %503  ;;  %v437_v29 = vsel %vm436_vm3, %v2414_v42, %v427_v12  ;;  %v438_v49 = vsel %vm436_vm3, %v427_v12, %v2386_v26  ;;  %v550_v42 = vperm.slane %v2445_v33, 4 }
 0x116   : > { %v458_v0 = vmul.f32 %v454_v57, %v437_v29  ;;  %v459_v30 = vmul.f32 %v455_v23, %v438_v49 }
 0x117   : > { %v554_v52 = vmul.f32 %v550_v42, %v2372_v15 }
 0x118   : > { %v466_v60 = vadd.f32 %v458_v0, %v411_v50  ;;  %v467_v35 = vadd.f32 %v459_v30, %v412_v56  ;;  %v555_v56 = vmul.f32 %v551_v34, %v2366_v13  ;;  %v482_v0 = vmul.f32 %v474_v2, %v2250_v38 }
 0x119   : > { %v483_v30 = vmul.f32 %v475_v54, %v2234_v32  ;;  %v528_v38 = vperm.slane %v2404_v31, 3 }
 0x11a   : > { %896 = vrot.lane.b32.xlu0 %v2215_v22, %s2124_s9  ;;  %842 = vrot.lane.b32.xlu1 %v2215_v22, %s2123_s8  ;;  %v487_v24 = vadd.f32 %v479_v41, %v467_v35  ;;  %v486_v26 = vadd.f32 %v478_v44, %v466_v60 }
 0x11b   : > { %888 = vrot.lane.b32.xlu2 %v2185_v5, %s2124_s9 }
 0x11c   : > { %v500_v58 = vpop.permute.xlu0 %499  ;;  %v433_v27 = vpop.permute.xlu1 %432 }
 0x11d   : > { %v2502_v63 = vpop.permute.xlu2 %622  ;;  %v512_v45 = vsel %vm509_vm4, %v2455_v51, %v500_v58  ;;  %v526_v16 = vsel %vm509_vm4, %v500_v58, %v494_v4  ;;  %v440_v12 = vsel %vm436_vm3, %v2453_v40, %v433_v27  ;;  %v441_v29 = vsel %vm436_vm3, %v433_v27, %v2416_v46 }
 0x11e   : > { %v534_v49 = vmul.f32 %v530_v61, %v512_v45  ;;  %v535_v55 = vmul.f32 %v531_v62, %v526_v16  ;;  %v462_v59 = vmul.f32 %v454_v57, %v440_v12  ;;  %v463_v50 = vmul.f32 %v455_v23, %v441_v29 }
 0x11f   : > { %v548_v23 = vperm.slane %v2404_v31, 4 }
 0x120   : > { %v542_v40 = vadd.f32 %v534_v49, %v487_v24  ;;  %v543_v41 = vadd.f32 %v535_v55, %v488_v25  ;;  %v470_v44 = vadd.f32 %v462_v59, %v415_v36  ;;  %v471_v46 = vadd.f32 %v463_v50, %v416_v11 }
 0x121   : > { %v549_v25 = vperm.slane %v2433_v1, 4  ;;  %v552_v27 = vmul.f32 %v548_v23, %v2351_v3  ;;  %v556_v59 = vmul.f32 %v548_v23, %v2419_v47 }
 0x122   : > { %958 = vrot.lane.b32.xlu0 %v2212_v21, %s2125_s10  ;;  %884 = vrot.lane.b32.xlu1 %v2200_v10, %s2124_s9  ;;  %v490_v13 = vadd.f32 %v482_v0, %v470_v44  ;;  %v491_v32 = vadd.f32 %v483_v30, %v471_v46  ;;  %v2529_v57 = vadd.f32 %v555_v56, %v543_v41  ;;  %v663_v41 = vperm.slane %v2394_v28, 5 }
 0x123   : > { %894 = vrot.lane.b32.xlu2 %v2194_v8, %s2124_s9  ;;  %v2535_v15 = vadd.f32 %v554_v52, %v542_v40  ;;  %v553_v45 = vmul.f32 %v549_v25, %v2369_v14  ;;  %v557_v16 = vmul.f32 %v549_v25, %v2381_v19  ;;  %v558_v46 = vmul.f32 %v550_v42, %v2384_v20 }
 0x124   : > { %v506_v54 = vpop.permute.xlu0 %505  ;;  %v496_v21 = vpop.permute.xlu1 %495  ;;  %v714_v20 = vperm.slane %v2404_v31, 6 }
 0x125   : > { %v2537_v2 = vpop.permute.xlu2 %636  ;;  %v514_v60 = vsel %vm509_vm4, %v2482_v18, %v506_v54  ;;  %v510_v35 = vsel %vm509_vm4, %v494_v4, %v496_v21  ;;  %v511_v24 = vsel %vm509_vm4, %v496_v21, %v2455_v51 }
 0x126   : > { %v537_v11 = vmul.f32 %v529_v53, %v514_v60  ;;  %v532_v36 = vmul.f32 %v528_v38, %v510_v35  ;;  %v533_v58 = vmul.f32 %v529_v53, %v511_v24  ;;  %v2053_v35 = vld [vmem:[%s3827_s4 + $0x38] sm:$0xff]  ;;  %v734_v24 = vperm.slane %v2404_v31, 7 }
 0x128   : > { %v545_v12 = vadd.f32 %v537_v11, %v490_v13  ;;  %v540_v29 = vadd.f32 %v532_v36, %v2474_v37  ;;  %v541_v49 = vadd.f32 %v533_v58, %v486_v26  ;;  %v661_v36 = vperm.slane %v2433_v1, 5 }
 0x129   : > { %v662_v58 = vperm.slane %v2445_v33, 5 }
 0x12a   : > { %892 = vrot.lane.b32.xlu1 %v2188_v6, %s2124_s9  ;;  %964 = vrot.lane.b32.xlu0 %v2194_v8, %s2125_s10  ;;  %v560_v51 = vadd.f32 %v552_v27, %v540_v29  ;;  %v2552_v4 = vadd.f32 %v553_v45, %v541_v49  ;;  %v2554_v55 = vadd.f32 %v557_v16, %v545_v12 }
 0x12b   : > { %956 = vrot.lane.b32.xlu2 %v2185_v5, %s2125_s10  ;;  %v660_v5 = vperm.slane %v2404_v31, 5  ;;  %v738_v27 = vmul.f32 %v734_v24, %v2285_v43  ;;  %v2052_v43 = vld [vmem:[%s3827_s4 + $0x30] sm:$0xff] }
 0x12c   : > { %v633_v3 = vpop.permute.xlu0 %632  ;;  %v502_v14 = vpop.permute.xlu1 %501 }
 0x12d   : > { %v2558_v19 = vpop.permute.xlu2 %642  ;;  %v513_v37 = vsel %vm509_vm4, %v502_v14, %v2482_v18 }
 0x12e   : > { %v2565_v26 = vsel %vm381_vm2, %v2558_v19, %v2502_v63  ;;  %v536_v8 = vmul.f32 %v528_v38, %v513_v37 }
 0x12f   : > { %v671_v38 = vmul.f32 %v663_v41, %v2565_v26 }
 0x130   : > { %v544_v50 = vadd.f32 %v536_v8, %v2476_v39 }
 0x132   : > { %898 = vrot.lane.b32.xlu1 %v2197_v9, %s2124_s9  ;;  %v564_v56 = vadd.f32 %v556_v59, %v544_v50  ;;  %970 = vrot.lane.b32.xlu0 %v2200_v10, %s2125_s10 }
 0x133   : > { %962 = vrot.lane.b32.xlu2 %v2191_v7, %s2125_s10 }
 0x134   : > { %v2576_v18 = vpop.permute.xlu0 %638  ;;  %v508_v0 = vpop.permute.xlu1 %507 }
 0x135   : > { %v687_v30 = vpop.permute.xlu2 %686  ;;  %v2581_v47 = vsel %vm381_vm2, %v2502_v63, %v2576_v18  ;;  %v515_v39 = vsel %vm509_vm4, %v506_v54, %v508_v0  ;;  %v527_v40 = vsel %vm509_vm4, %v508_v0, %v502_v14  ;;  %v559_v63 = vmul.f32 %v551_v34, %v2422_v48 }
 0x136   : > { %v668_v10 = vmul.f32 %v660_v5, %v2581_v47  ;;  %v538_v7 = vmul.f32 %v530_v61, %v515_v39  ;;  %v539_v44 = vmul.f32 %v531_v62, %v527_v40 }
 0x138   : > { %v2597_v52 = vadd.f32 %v668_v10, %v564_v56  ;;  %v546_v53 = vadd.f32 %v538_v7, %v491_v32  ;;  %v547_v13 = vadd.f32 %v539_v44, %v2450_v17  ;;  %v3843_v56 = vld [vmem:[#allocation6_spill] sm:$0xff] }
 0x13a   : > { %v567_v23 = vadd.f32 %v559_v63, %v547_v13  ;;  %960 = vrot.lane.b32.xlu1 %v2188_v6, %s2125_s10  ;;  %v566_v61 = vadd.f32 %v558_v46, %v546_v53 }
 0x13b   : > { %968 = vrot.lane.b32.xlu2 %v2197_v9, %s2125_s10 }
 0x13c   : > { %v2606_v62 = vpop.permute.xlu0 %680  ;;  %v621_v48 = vpop.permute.xlu1 %620  ;;  %v2608_v34 = vadd.f32 %v671_v38, %v567_v23 }
 0x13d   : > { %v693_v42 = vpop.permute.xlu2 %692  ;;  %v712_v17 = vsel %vm436_vm3, %v2606_v62, %v687_v30  ;;  %v2614_v32 = vsel %vm381_vm2, %v2537_v2, %v621_v48  ;;  %v2617_v6 = vsel %vm381_vm2, %v621_v48, %v633_v3 }
 0x13e   : > { %v664_v9 = vmul.f32 %v660_v5, %v2617_v6  ;;  %v667_v25 = vmul.f32 %v663_v41, %v2614_v32  ;;  %v718_v54 = vmul.f32 %v714_v20, %v712_v17  ;;  %v735_v5 = vperm.slane %v2433_v1, 7 }
 0x140   : > { %v672_v21 = vadd.f32 %v664_v9, %v560_v51  ;;  %v2624_v60 = vadd.f32 %v667_v25, %v2529_v57  ;;  %v715_v57 = vperm.slane %v2433_v1, 6  ;;  %v739_v0 = vmul.f32 %v735_v5, %v3843_v56 }
 0x142   : > { %v726_v11 = vadd.f32 %v718_v54, %v672_v21  ;;  %966 = vrot.lane.b32.xlu1 %v2215_v22, %s2125_s10 }
 0x143   : > { %1069 = vperm.xlu2 %2082, %v2053_v35  }
 0x144   : > { %v689_v45 = vpop.permute.xlu0 %688  ;;  %v635_v16 = vpop.permute.xlu1 %634  ;;  %v746_v12 = vadd.f32 %v738_v27, %v726_v11 }
 0x145   : > { %v755_v29 = vpop.permute.xlu2 %754  ;;  %v698_v49 = vsel %vm436_vm3, %v687_v30, %v689_v45  ;;  %v644_v51 = vsel %vm381_vm2, %v633_v3, %v635_v16  ;;  %v2642_v22 = vsel %vm381_vm2, %v635_v16, %v2537_v2  ;;  %v2054_v3 = vld [vmem:[%s3827_s4 + $0x40] sm:$0xff] }
 0x146   : > { %v665_v14 = vmul.f32 %v661_v36, %v644_v51  ;;  %v666_v37 = vmul.f32 %v662_v58, %v2642_v22  ;;  %v719_v8 = vmul.f32 %v715_v57, %v698_v49  ;;  %v737_v49 = vperm.slane %v2394_v28, 7 }
 0x148   : > { %v673_v59 = vadd.f32 %v665_v14, %v2552_v4  ;;  %v674_v50 = vadd.f32 %v666_v37, %v2535_v15  ;;  %v3844_v37 = vld [vmem:[#allocation4_spill] sm:$0xff] }
 0x14a   : > { %v727_v2 = vadd.f32 %v719_v8, %v673_v59  ;;  %1064 = vperm.xlu1 %2083, %v2052_v43   ;;  %v741_v43 = vmul.f32 %v737_v49, %v3844_v37 }
 0x14b   : > { %1324 = vperm.xlu2 %2082, %v2054_v3  }
 0x14c   : > { %v695_v30 = vpop.permute.xlu0 %694  ;;  %v641_v39 = vpop.permute.xlu1 %640  ;;  %v2657_v40 = vadd.f32 %v739_v0, %v727_v2 }
 0x14d   : > { %v2659_v4 = vpop.permute.xlu2 %760  ;;  %v701_v15 = vsel %vm436_vm3, %v693_v42, %v695_v30  ;;  %v2664_v41 = vsel %vm381_vm2, %v2576_v18, %v641_v39  ;;  %v2668_v10 = vsel %vm381_vm2, %v641_v39, %v2558_v19  ;;  %v2678_v18 = vld [vmem:[%s3825_s2 + $0x20] sm:$0xff] }
 0x14e   : > { %v786_v7 = vsel %vm509_vm4, %v2659_v4, %v755_v29  ;;  %v669_v44 = vmul.f32 %v661_v36, %v2664_v41  ;;  %v670_v46 = vmul.f32 %v662_v58, %v2668_v10  ;;  %v723_v63 = vmul.f32 %v715_v57, %v701_v15 }
 0x14f   : > { %v788_v19 = vperm.slane %v2678_v18, 0  ;;  %v808_v23 = vperm.slane %v2678_v18, 1  ;;  %v716_v36 = vperm.slane %v2445_v33, 6  ;;  %v717_v58 = vperm.slane %v2394_v28, 6  ;;  %v2726_v28 = vld [vmem:[%s3825_s2 + $0x30] sm:$0xff] }
 0x150   : > { %v677_v53 = vadd.f32 %v669_v44, %v2554_v55  ;;  %v678_v13 = vadd.f32 %v670_v46, %v566_v61 }
 0x151   : > { %v812_v21 = vmul.f32 %v808_v23, %v644_v51 }
 0x152   : > { %v2680_v38 = vadd.f32 %v723_v63, %v677_v53 }
 0x154   : > { %v2684_v48 = vpop.permute.xlu0 %756  ;;  %v683_v17 = vpop.permute.xlu1 %682 }
 0x155   : > { %v2686_v9 = vpop.permute.xlu2 %766  ;;  %v770_v55 = vsel %vm509_vm4, %v755_v29, %v2684_v48  ;;  %v713_v61 = vsel %vm436_vm3, %v683_v17, %v693_v42 }
 0x156   : > { %v792_v25 = vmul.f32 %v788_v19, %v770_v55  ;;  %v722_v54 = vmul.f32 %v714_v20, %v713_v61  ;;  %v2709_v20 = vld [vmem:[%s3825_s2 + $0x38] sm:$0xff]  ;;  %v2742_v55 = vld [vmem:[%s3825_s2 + $0x28] sm:$0xff] }
 0x157   : > { %v791_v29 = vperm.slane %v2709_v20, 0  ;;  %v811_v3 = vperm.slane %v2709_v20, 1  ;;  %v3845_v61 = vld [vmem:[#allocation7_spill] sm:$0xff] }
 0x158   : > { %v800_v35 = vadd.f32 %v792_v25, %v746_v12  ;;  %v2698_v11 = vadd.f32 %v722_v54, %v2597_v52  ;;  %v3846_v54 = vld [vmem:[#allocation3_spill] sm:$0xff] }
 0x159   : > { %v795_v2 = vmul.f32 %v791_v29, %v786_v7 }
 0x15a   : > { %v2702_v27 = vadd.f32 %v812_v21, %v800_v35  ;;  %v745_v21 = vmul.f32 %v737_v49, %v3846_v54  ;;  %v3849_v54 = vld [vmem:[#allocation8_spill] sm:$0xff] }
 0x15c   : > { %v2704_v42 = vpop.permute.xlu0 %762  ;;  %v691_v57 = vpop.permute.xlu1 %690 }
 0x15d   : > { %v2711_v16 = vpop.permute.xlu2 %830  ;;  %v699_v12 = vsel %vm436_vm3, %v689_v45, %v691_v57  ;;  %v700_v52 = vsel %vm436_vm3, %v691_v57, %v2606_v62  ;;  %v815_v45 = vmul.f32 %v811_v3, %v2617_v6  ;;  %v736_v62 = vperm.slane %v2445_v33, 7 }
 0x15e   : > { %v720_v51 = vmul.f32 %v716_v36, %v699_v12  ;;  %v721_v14 = vmul.f32 %v717_v58, %v700_v52  ;;  %v790_v33 = vperm.slane %v2726_v28, 0  ;;  %v789_v57 = vperm.slane %v2742_v55, 0 }
 0x15f   : > { %v744_v25 = vmul.f32 %v736_v62, %v3845_v61 }
 0x160   : > { %v728_v8 = vadd.f32 %v720_v51, %v674_v50  ;;  %v729_v59 = vadd.f32 %v721_v14, %v2624_v60  ;;  %v865_v51 = vperm.slane %v2709_v20, 2  ;;  %v3847_v14 = vld [vmem:[#allocation5_spill] sm:$0xff] }
 0x161   : > { %v740_v37 = vmul.f32 %v736_v62, %v3847_v14 }
 0x162   : > { %v749_v56 = vadd.f32 %v741_v43, %v729_v59  ;;  %v819_v43 = vmul.f32 %v811_v3, %v2581_v47  ;;  %v809_v59 = vperm.slane %v2742_v55, 1 }
 0x164   : > { %v769_v0 = vpop.permute.xlu0 %768  ;;  %v697_v39 = vpop.permute.xlu1 %696  ;;  %v803_v15 = vadd.f32 %v795_v2, %v749_v56 }
 0x165   : > { %v2728_v44 = vpop.permute.xlu2 %838  ;;  %v775_v60 = vsel %vm509_vm4, %v2686_v9, %v769_v0  ;;  %v787_v50 = vsel %vm509_vm4, %v769_v0, %v2704_v42  ;;  %v702_v6 = vsel %vm436_vm3, %v695_v30, %v697_v39  ;;  %v703_v7 = vsel %vm436_vm3, %v697_v39, %v683_v17 }
 0x166   : > { %v724_v46 = vmul.f32 %v716_v36, %v702_v6  ;;  %v725_v63 = vmul.f32 %v717_v58, %v703_v7  ;;  %v2737_v53 = vadd.f32 %v815_v45, %v803_v15  ;;  %v810_v17 = vperm.slane %v2726_v28, 1 }
 0x167   : > { %v798_v36 = vmul.f32 %v790_v33, %v775_v60  ;;  %v799_v58 = vmul.f32 %v791_v29, %v787_v50  ;;  %v748_v29 = vadd.f32 %v740_v37, %v728_v8  ;;  %v813_v50 = vmul.f32 %v809_v59, %v2642_v22 }
 0x168   : > { %v732_v35 = vadd.f32 %v724_v46, %v678_v13  ;;  %v733_v30 = vadd.f32 %v725_v63, %v2608_v34  ;;  %v818_v56 = vmul.f32 %v810_v17, %v2565_v26  ;;  %v814_v8 = vmul.f32 %v810_v17, %v2614_v32 }
 0x169   : > { %v862_v63 = vperm.slane %v2678_v18, 2  ;;  %v743_v32 = vmul.f32 %v735_v5, %v3849_v54  ;;  %v816_v5 = vmul.f32 %v808_v23, %v2664_v41  ;;  %v936_v54 = vperm.slane %v2678_v18, 4 }
 0x16a   : > { %v752_v12 = vadd.f32 %v744_v25, %v732_v35  ;;  %v753_v52 = vadd.f32 %v745_v21, %v733_v30  ;;  %v3848_v25 = vld [vmem:[#allocation2_spill] sm:$0xff] }
 0x16b   : > { %v751_v17 = vadd.f32 %v743_v32, %v2680_v38 }
 0x16c   : > { %v807_v49 = vadd.f32 %v799_v58, %v753_v52  ;;  %v2753_v13 = vpop.permute.xlu0 %834  ;;  %v759_v34 = vpop.permute.xlu1 %758  ;;  %v806_v2 = vadd.f32 %v798_v36, %v752_v12 }
 0x16d   : > { %v2756_v45 = vpop.permute.xlu2 %844  ;;  %v771_v0 = vsel %vm509_vm4, %v2684_v48, %v759_v34  ;;  %v772_v62 = vsel %vm509_vm4, %v759_v34, %v2659_v4 }
 0x16e   : > { %v827_v39 = vadd.f32 %v819_v43, %v807_v49  ;;  %v2765_v47 = vsel %vm381_vm2, %v2756_v45, %v2711_v16  ;;  %v793_v3 = vmul.f32 %v789_v57, %v771_v0  ;;  %v794_v15 = vmul.f32 %v790_v33, %v772_v62 }
 0x16f   : > { %v873_v60 = vmul.f32 %v865_v51, %v2765_v47  ;;  %v2768_v26 = vadd.f32 %v818_v56, %v806_v2  ;;  %v742_v33 = vmul.f32 %v734_v24, %v3848_v25  ;;  %v917_v2 = vperm.slane %v2742_v55, 3 }
 0x170   : > { %v801_v48 = vadd.f32 %v793_v3, %v2657_v40  ;;  %v802_v6 = vadd.f32 %v794_v15, %v748_v29  ;;  %v863_v56 = vperm.slane %v2742_v55, 2  ;;  %v864_v29 = vperm.slane %v2726_v28, 2 }
 0x171   : > { %v2773_v4 = vadd.f32 %v873_v60, %v827_v39  ;;  %v750_v31 = vadd.f32 %v742_v33, %v2698_v11 }
 0x172   : > { %v821_v7 = vadd.f32 %v813_v50, %v801_v48  ;;  %v822_v46 = vadd.f32 %v814_v8, %v802_v6 }
 0x174   : > { %v841_v61 = vpop.permute.xlu0 %840  ;;  %v765_v21 = vpop.permute.xlu1 %764 }
 0x175   : > { %v889_v22 = vpop.permute.xlu2 %888  ;;  %v2784_v40 = vsel %vm381_vm2, %v2711_v16, %v841_v61  ;;  %v773_v35 = vsel %vm509_vm4, %v2704_v42, %v765_v21  ;;  %v774_v30 = vsel %vm509_vm4, %v765_v21, %v2686_v9  ;;  %v817_v16 = vmul.f32 %v809_v59, %v2668_v10 }
 0x176   : > { %v796_v1 = vmul.f32 %v788_v19, %v773_v35  ;;  %v797_v24 = vmul.f32 %v789_v57, %v774_v30  ;;  %v870_v36 = vmul.f32 %v862_v63, %v2784_v40  ;;  %v916_v9 = vperm.slane %v2678_v18, 3  ;;  %v2850_v30 = vld [vmem:[%s2182_s7] sm:$0xff] }
 0x178   : > { %v804_v42 = vadd.f32 %v796_v1, %v750_v31  ;;  %v805_v58 = vadd.f32 %v797_v24, %v751_v17  ;;  %v990_v17 = vperm.slane %v2678_v18, 5  ;;  %v1010_v31 = vperm.slane %v2678_v18, 6 }
 0x17a   : > { %v824_v12 = vadd.f32 %v816_v5, %v804_v42  ;;  %v825_v38 = vadd.f32 %v817_v16, %v805_v58 }
 0x17c   : > { %v2800_v52 = vpop.permute.xlu0 %882  ;;  %v829_v11 = vpop.permute.xlu1 %828  ;;  %v878_v14 = vadd.f32 %v870_v36, %v824_v12  ;;  %v2867_v12 = vld [vmem:[%s2182_s7 + $0x18] sm:$0xff] }
 0x17d   : > { %v895_v19 = vpop.permute.xlu2 %894  ;;  %v914_v57 = vsel %vm436_vm3, %v2800_v52, %v889_v22  ;;  %v2806_v41 = vsel %vm381_vm2, %v2728_v44, %v829_v11  ;;  %v2810_v10 = vsel %vm381_vm2, %v829_v11, %v2753_v13  ;;  %v2871_v11 = vld [vmem:[%s2182_s7 + $0x38] sm:$0xff] }
 0x17e   : > { %v920_v23 = vmul.f32 %v916_v9, %v914_v57  ;;  %v866_v37 = vmul.f32 %v862_v63, %v2810_v10  ;;  %v869_v43 = vmul.f32 %v865_v51, %v2806_v41  ;;  %v1041_v57 = vrot.slane %v2871_v11, 1 }
 0x180   : > { %v874_v59 = vadd.f32 %v866_v37, %v2702_v27  ;;  %v2816_v49 = vadd.f32 %v869_v43, %v2737_v53 }
 0x182   : > { %v928_v34 = vadd.f32 %v920_v23, %v874_v59  ;;  %v918_v59 = vperm.slane %v2726_v28, 3 }
 0x184   : > { %v891_v0 = vpop.permute.xlu0 %890  ;;  %v837_v62 = vpop.permute.xlu1 %836 }
 0x185   : > { %v957_v39 = vpop.permute.xlu2 %956  ;;  %v900_v3 = vsel %vm436_vm3, %v889_v22, %v891_v0  ;;  %v846_v51 = vsel %vm381_vm2, %v2753_v13, %v837_v62  ;;  %v2826_v27 = vsel %vm381_vm2, %v837_v62, %v2728_v44 }
 0x186   : > { %v921_v53 = vmul.f32 %v917_v2, %v900_v3  ;;  %v867_v15 = vmul.f32 %v863_v56, %v846_v51  ;;  %v868_v60 = vmul.f32 %v864_v29, %v2826_v27  ;;  %v1014_v23 = vmul.f32 %v1010_v31, %v846_v51 }
 0x188   : > { %v875_v8 = vadd.f32 %v867_v15, %v821_v7  ;;  %v876_v50 = vadd.f32 %v868_v60, %v822_v46  ;;  %v993_v15 = vperm.slane %v2709_v20, 5 }
 0x18a   : > { %v2829_v48 = vadd.f32 %v921_v53, %v875_v8 }
 0x18c   : > { %v897_v6 = vpop.permute.xlu0 %896  ;;  %v843_v63 = vpop.permute.xlu1 %842 }
 0x18d   : > { %v2831_v25 = vpop.permute.xlu2 %962  ;;  %v903_v33 = vsel %vm436_vm3, %v895_v19, %v897_v6  ;;  %v2835_v13 = vsel %vm381_vm2, %v841_v61, %v843_v63  ;;  %v2839_v44 = vsel %vm381_vm2, %v843_v63, %v2756_v45  ;;  %v940_v45 = vmul.f32 %v2850_v30, %v936_v54 }
 0x18e   : > { %v988_v7 = vsel %vm509_vm4, %v2831_v25, %v957_v39  ;;  %v925_v46 = vmul.f32 %v917_v2, %v903_v33  ;;  %v871_v32 = vmul.f32 %v863_v56, %v2835_v13  ;;  %v872_v21 = vmul.f32 %v864_v29, %v2839_v44 }
 0x18f   : > { %v948_v36 = vadd.f32 %v940_v45, %v928_v34  ;;  %v919_v34 = vperm.slane %v2709_v20, 3  ;;  %v939_v2 = vperm.slane %v2709_v20, 4  ;;  %v997_v33 = vmul.f32 %v993_v15, %v988_v7 }
 0x190   : > { %v879_v22 = vadd.f32 %v871_v32, %v825_v38  ;;  %v880_v35 = vadd.f32 %v872_v21, %v2768_v26  ;;  %v1040_v38 = vrot.slane %v2867_v12, 1  ;;  %v938_v45 = vperm.slane %v2726_v28, 4 }
 0x191   : > { %v943_v60 = vmul.f32 %v2867_v12, %v939_v2  ;;  %v937_v7 = vperm.slane %v2742_v55, 4 }
 0x192   : > { %v2847_v61 = vadd.f32 %v925_v46, %v879_v22 }
 0x194   : > { %v2857_v1 = vpop.permute.xlu0 %958  ;;  %v885_v24 = vpop.permute.xlu1 %884 }
 0x195   : > { %v2859_v5 = vpop.permute.xlu2 %968  ;;  %v972_v26 = vsel %vm509_vm4, %v957_v39, %v2857_v1  ;;  %v915_v16 = vsel %vm436_vm3, %v885_v24, %v895_v19 }
 0x196   : > { %v994_v42 = vmul.f32 %v990_v17, %v972_v26  ;;  %v924_v58 = vmul.f32 %v916_v9, %v915_v16  ;;  %v1058_v9 = vsel %vm1030_vm5, %v1041_v57, %v1040_v38  ;;  %v992_v26 = vperm.slane %v2726_v28, 5 }
 0x198   : > { %v1002_v37 = vadd.f32 %v994_v42, %v948_v36  ;;  %v2876_v43 = vadd.f32 %v924_v58, %v878_v14  ;;  %v2914_v42 = vld [vmem:[%s2182_s7 + $0x30] sm:$0xff]  ;;  %v1012_v58 = vperm.slane %v2726_v28, 6 }
 0x19a   : > { %v2878_v19 = vadd.f32 %v1014_v23, %v1002_v37 }
 0x19c   : > { %v893_v56 = vpop.permute.xlu1 %892  ;;  %v2888_v29 = vpop.permute.xlu0 %964 }
 0x19d   : > { %v2890_v14 = vpop.permute.xlu2 %1069  ;;  %v901_v62 = vsel %vm436_vm3, %v891_v0, %v893_v56  ;;  %v902_v39 = vsel %vm436_vm3, %v893_v56, %v2800_v52  ;;  %v1013_v0 = vperm.slane %v2709_v20, 6 }
 0x19e   : > { %v2896_v3 = vmul.f32 %v2890_v14, %v1058_v9  ;;  %v922_v51 = vmul.f32 %v918_v59, %v901_v62  ;;  %v923_v53 = vmul.f32 %v919_v34, %v902_v39 }
 0x19f   : > { %v1017_v23 = vmul.f32 %v1013_v0, %v2810_v10  ;;  %v1020_v10 = vmul.f32 %v1012_v58, %v2765_v47 }
 0x1a0   : > { %1084 = vrot.lane.b32.xlu1 %v2896_v3, %s2123_s8  ;;  %v930_v8 = vadd.f32 %v922_v51, %v876_v50  ;;  %v931_v63 = vadd.f32 %v923_v53, %v2816_v49  ;;  %v2922_v51 = vld [vmem:[%s2182_s7 + $0x8] sm:$0xff] }
 0x1a2   : > { %v951_v52 = vadd.f32 %v943_v60, %v931_v63 }
 0x1a4   : > { %v899_v46 = vpop.permute.xlu1 %898  ;;  %v971_v32 = vpop.permute.xlu0 %970  ;;  %v1005_v37 = vadd.f32 %v997_v33, %v951_v52 }
 0x1a5   : > { %v904_v21 = vsel %vm436_vm3, %v897_v6, %v899_v46  ;;  %v905_v22 = vsel %vm436_vm3, %v899_v46, %v885_v24  ;;  %v977_v50 = vsel %vm509_vm4, %v2859_v5, %v971_v32  ;;  %v989_v49 = vsel %vm509_vm4, %v971_v32, %v2888_v29 }
 0x1a6   : > { %v926_v16 = vmul.f32 %v918_v59, %v904_v21  ;;  %v927_v36 = vmul.f32 %v919_v34, %v905_v22  ;;  %v946_v6 = vmul.f32 %v2914_v42, %v938_v45  ;;  %v947_v24 = vmul.f32 %v2871_v11, %v939_v2  ;;  %v2926_v34 = vld [vmem:[%s2182_s7 + $0x10] sm:$0xff] }
 0x1a7   : > { %v1000_v62 = vmul.f32 %v992_v26, %v977_v50  ;;  %v1001_v39 = vmul.f32 %v993_v15, %v989_v49  ;;  %v941_v59 = vmul.f32 %v2922_v51, %v937_v7  ;;  %v942_v53 = vmul.f32 %v2926_v34, %v938_v45 }
 0x1a8   : > { %v934_v9 = vadd.f32 %v926_v16, %v880_v35  ;;  %v935_v56 = vadd.f32 %v927_v36, %v2773_v4  ;;  %v991_v2 = vperm.slane %v2742_v55, 5  ;;  %v2930_v60 = vadd.f32 %v1017_v23, %v1005_v37 }
 0x1a9   : > { %v1021_v35 = vmul.f32 %v1013_v0, %v2784_v40  ;;  %v1011_v15 = vperm.slane %v2742_v55, 6  ;;  %v949_v22 = vadd.f32 %v941_v59, %v2829_v48  ;;  %v950_v47 = vadd.f32 %v942_v53, %v930_v8  ;;  %v2953_v48 = vld [vmem:[%s2182_s7 + $0x28] sm:$0xff] }
 0x1aa   : > { %v954_v63 = vadd.f32 %v946_v6, %v934_v9  ;;  %v955_v4 = vadd.f32 %v947_v24, %v935_v56  ;;  %v1016_v49 = vmul.f32 %v1012_v58, %v2806_v41  ;;  %v2947_v24 = vld [vmem:[%s2182_s7 + $0x20] sm:$0xff]  ;;  %v1042_v53 = vsel %vm1030_vm5, %v1040_v38, %v1041_v57 }
 0x1ab   : > { %v1015_v16 = vmul.f32 %v1011_v15, %v2826_v27  ;;  %v1032_v56 = vrot.slane %v2947_v24, 1 }
 0x1ac   : > { %v961_v33 = vpop.permute.xlu1 %960  ;;  %v1008_v52 = vadd.f32 %v1000_v62, %v954_v63  ;;  %v1009_v46 = vadd.f32 %v1001_v39, %v955_v4  ;;  %v1034_v62 = vrot.slane %v2922_v51, 1  ;;  %v1035_v39 = vrot.slane %v2953_v48, 1  ;;  %v2055_v63 = vld [vmem:[%s3827_s4 + $0x48] sm:$0xff] }
 0x1ad   : > { %v973_v32 = vsel %vm509_vm4, %v2857_v1, %v961_v33  ;;  %v974_v21 = vsel %vm509_vm4, %v961_v33, %v2831_v25  ;;  %v944_v25 = vmul.f32 %v2947_v24, %v936_v54  ;;  %v945_v1 = vmul.f32 %v2953_v48, %v937_v7 }
 0x1ae   : > { %v995_v45 = vmul.f32 %v991_v2, %v973_v32  ;;  %v996_v40 = vmul.f32 %v992_v26, %v974_v21  ;;  %v2940_v0 = vadd.f32 %v1020_v10, %v1008_v52  ;;  %v2942_v50 = vadd.f32 %v1021_v35, %v1009_v46 }
 0x1af   : > { %v953_v58 = vadd.f32 %v945_v1, %v2847_v61  ;;  %v952_v37 = vadd.f32 %v944_v25, %v2876_v43  ;;  %v1031_v7 = vrot.slane %v2850_v30, 1  ;;  %v1019_v61 = vmul.f32 %v1011_v15, %v2839_v44 }
 0x1b0   : > { %v1003_v36 = vadd.f32 %v995_v45, %v949_v22  ;;  %v1004_v6 = vadd.f32 %v996_v40, %v950_v47  ;;  %v1056_v38 = vsel %vm1030_vm5, %v1035_v39, %v1034_v62  ;;  %v1037_v33 = vrot.slane %v2926_v34, 1  ;;  %v1325_v40 = vpop.permute.xlu2 %1324 }
 0x1b1   : > { %v1033_v59 = vsel %vm1030_vm5, %v1031_v7, %v1032_v56  ;;  %v1055_v57 = vsel %vm1030_vm5, %v1032_v56, %v1031_v7  ;;  %v3005_v4 = vmul.f32 %v2890_v14, %v1056_v38  ;;  %v1038_v52 = vrot.slane %v2914_v42, 1 }
 0x1b2   : > { %v2956_v8 = vadd.f32 %v1015_v16, %v1003_v36  ;;  %v2958_v26 = vadd.f32 %v1016_v49, %v1004_v6  ;;  %v3008_v15 = vmul.f32 %v2890_v14, %v1055_v57  ;;  %v1301_v47 = vrot.slane %v2871_v11, 2 }
 0x1b3   : > { %v1039_v46 = vsel %vm1030_vm5, %v1037_v33, %v1038_v52  ;;  %v1057_v21 = vsel %vm1030_vm5, %v1038_v52, %v1037_v33  ;;  %v1297_v16 = vrot.slane %v2926_v34, 2  ;;  %v1294_v11 = vrot.slane %v2922_v51, 2 }
 0x1b4   : > { %v967_v23 = vpop.permute.xlu1 %966  ;;  %v3027_v22 = vmul.f32 %v2890_v14, %v1057_v21  ;;  %v1300_v14 = vrot.slane %v2867_v12, 2  ;;  %v1298_v12 = vrot.slane %v2914_v42, 2  ;;  %v1295_v36 = vrot.slane %v2953_v48, 2 }
 0x1b5   : > { %v975_v41 = vsel %vm509_vm4, %v2888_v29, %v967_v23  ;;  %v976_v27 = vsel %vm509_vm4, %v967_v23, %v2859_v5  ;;  %v1018_v5 = vmul.f32 %v1010_v31, %v2835_v13  ;;  %v1291_v42 = vrot.slane %v2850_v30, 2 }
 0x1b6   : > { %v998_v54 = vmul.f32 %v990_v17, %v975_v41  ;;  %v999_v9 = vmul.f32 %v991_v2, %v976_v27  ;;  %v1036_v17 = vsel %vm1030_vm5, %v1034_v62, %v1035_v39  ;;  %v1302_v45 = vsel %vm1290_vm6, %v1300_v14, %v1301_v47 }
 0x1b7   : > { %v3056_v49 = vmul.f32 %v1325_v40, %v1302_v45  ;;  %v1299_v6 = vsel %vm1290_vm6, %v1297_v16, %v1298_v12  ;;  %v1296_v25 = vsel %vm1290_vm6, %v1294_v11, %v1295_v36  ;;  %v1292_v51 = vrot.slane %v2947_v24, 2 }
 0x1b8   : > { %v1006_v29 = vadd.f32 %v998_v54, %v952_v37  ;;  %v1007_v43 = vadd.f32 %v999_v9, %v953_v58  ;;  %v3070_v34 = vmul.f32 %v1325_v40, %v1299_v6  ;;  %v3074_v48 = vmul.f32 %v1325_v40, %v1296_v25 }
 0x1b9   : > { %v1293_v1 = vsel %vm1290_vm6, %v1291_v42, %v1292_v51  ;;  %v1122_v58 = vperm.slane %v2678_v18, 7  ;;  %v1123_v37 = vperm.slane %v2742_v55, 7  ;;  %v1315_v55 = vsel %vm1290_vm6, %v1292_v51, %v1291_v42 }
 0x1ba   : > { %v2983_v2 = vadd.f32 %v1019_v61, %v1007_v43  ;;  %v2985_v10 = vadd.f32 %v1018_v5, %v1006_v29  ;;  %v3083_v23 = vmul.f32 %v1325_v40, %v1293_v1  ;;  %v1316_v29 = vsel %vm1290_vm6, %v1295_v36, %v1294_v11  ;;  %v3145_v40 = vld [vmem:[%s3825_s2 + $0x40] sm:$0xff] }
 0x1bb   : > { %v1318_v43 = vsel %vm1290_vm6, %v1301_v47, %v1300_v14  ;;  %v1317_v14 = vsel %vm1290_vm6, %v1298_v12, %v1297_v16  ;;  %v1124_v47 = vperm.slane %v2726_v28, 7  ;;  %v1125_v45 = vperm.slane %v2709_v20, 7 }
 0x1bc   : > { %v1065_v35 = vpop.permute.xlu1 %1064  ;;  %v1176_v36 = vperm.slane %v3145_v40, 0  ;;  %v1196_v1 = vperm.slane %v3145_v40, 1 }
 0x1bd   : > { %v2987_v13 = vmul.f32 %v1065_v35, %v1033_v59  ;;  %v2989_v44 = vmul.f32 %v1065_v35, %v1036_v17  ;;  %v2991_v31 = vmul.f32 %v1065_v35, %v1042_v53  ;;  %v3017_v32 = vmul.f32 %v1065_v35, %v1039_v46 }
 0x1bf   : > { %1082 = vrot.lane.b32.xlu0 %v2991_v31, %s2123_s8  ;;  %1096 = vrot.lane.b32.xlu2 %v2989_v44, %s2123_s8 }
 0x1c0   : > { %1094 = vrot.lane.b32.xlu1 %v2987_v13, %s2123_s8 }
 0x1c7   : > { %1329 = vperm.xlu0 %2081, %v2055_v63   ;;  %1102 = vrot.lane.b32.xlu2 %v3005_v4, %s2123_s8 }
 0x1c8   : > { %1100 = vrot.lane.b32.xlu1 %v3008_v15, %s2123_s8 }
 0x1cf   : > { %1098 = vrot.lane.b32.xlu0 %v3017_v32, %s2123_s8  ;;  %1148 = vrot.lane.b32.xlu2 %v2987_v13, %s2124_s9 }
 0x1d0   : > { %1142 = vrot.lane.b32.xlu1 %v2991_v31, %s2124_s9 }
 0x1d7   : > { %1104 = vrot.lane.b32.xlu0 %v3027_v22, %s2123_s8  ;;  %1144 = vrot.lane.b32.xlu2 %v2896_v3, %s2124_s9 }
 0x1d8   : > { %1152 = vrot.lane.b32.xlu1 %v3017_v32, %s2124_s9 }
 0x1df   : > { %1150 = vrot.lane.b32.xlu0 %v2989_v44, %s2124_s9  ;;  %1158 = vrot.lane.b32.xlu2 %v3027_v22, %s2124_s9 }
 0x1e0   : > { %1156 = vrot.lane.b32.xlu1 %v3005_v4, %s2124_s9 }
 0x1e7   : > { %1154 = vrot.lane.b32.xlu0 %v3008_v15, %s2124_s9  ;;  %1220 = vrot.lane.b32.xlu2 %v3017_v32, %s2125_s10 }
 0x1e8   : > { %1218 = vrot.lane.b32.xlu1 %v2989_v44, %s2125_s10 }
 0x1ef   : > { %1216 = vrot.lane.b32.xlu0 %v2987_v13, %s2125_s10  ;;  %1226 = vrot.lane.b32.xlu2 %v3005_v4, %s2125_s10 }
 0x1f0   : > { %1224 = vrot.lane.b32.xlu1 %v3008_v15, %s2125_s10 }
 0x1f7   : > { %1222 = vrot.lane.b32.xlu0 %v2991_v31, %s2125_s10  ;;  %1342 = vrot.lane.b32.xlu2 %v3056_v49, %s2123_s8 }
 0x1f8   : > { %1230 = vrot.lane.b32.xlu1 %v2896_v3, %s2125_s10 }
 0x1ff   : > { %1228 = vrot.lane.b32.xlu0 %v3027_v22, %s2125_s10  ;;  %1358 = vrot.lane.b32.xlu2 %v3070_v34, %s2123_s8 }
 0x200   : > { %1356 = vrot.lane.b32.xlu1 %v3074_v48, %s2123_s8 }
 0x207   : > { %1354 = vrot.lane.b32.xlu0 %v3083_v23, %s2123_s8 }
 0x212   : > { %v1085_v27 = vpop.permute.xlu1 %1084 }
 0x219   : > { %v1097_v30 = vpop.permute.xlu2 %1096 }
 0x221   : > { %v1103_v24 = vpop.permute.xlu2 %1102 }
 0x229   : > { %v3087_v41 = vpop.permute.xlu2 %1148 }
 0x231   : > { %v1083_v54 = vpop.permute.xlu0 %1082  ;;  %v3091_v9 = vpop.permute.xlu2 %1144 }
 0x232   : > { %v1095_v7 = vpop.permute.xlu1 %1094 }
 0x233   : > { %v3094_v56 = vsel %vm381_vm2, %v1095_v7, %v1097_v30  ;;  %v3097_v62 = vsel %vm381_vm2, %v1083_v54, %v1095_v7 }
 0x234   : > { %v1126_v39 = vmul.f32 %v1122_v58, %v3097_v62  ;;  %v1127_v5 = vmul.f32 %v1123_v37, %v3094_v56 }
 0x236   : > { %v1134_v61 = vadd.f32 %v1126_v39, %v2878_v19  ;;  %v3103_v18 = vadd.f32 %v1127_v5, %v2956_v8 }
 0x239   : > { %v1330_v59 = vpop.permute.xlu0 %1329  ;;  %v3108_v17 = vpop.permute.xlu2 %1158 }
 0x23a   : > { %v3110_v53 = vmul.f32 %v1330_v59, %v1315_v55  ;;  %v3112_v35 = vmul.f32 %v1330_v59, %v1316_v29  ;;  %v3114_v38 = vmul.f32 %v1330_v59, %v1318_v43  ;;  %v1101_v57 = vpop.permute.xlu1 %1100  ;;  %v1165_v19 = vsel %vm436_vm3, %v3108_v17, %v3091_v9 }
 0x23b   : > { %v3120_v8 = vsel %vm381_vm2, %v1101_v57, %v1103_v24  ;;  %v3123_v63 = vsel %vm381_vm2, %v1085_v27, %v1101_v57  ;;  %v3148_v6 = vmul.f32 %v1330_v59, %v1317_v14 }
 0x23c   : > { %v1130_v33 = vmul.f32 %v1122_v58, %v3123_v63  ;;  %v1131_v52 = vmul.f32 %v1123_v37, %v3120_v8  ;;  %1344 = vrot.lane.b32.xlu0 %v3114_v38, %s2123_s8  ;;  %1362 = vrot.lane.b32.xlu2 %v3112_v35, %s2123_s8 }
 0x23d   : > { %1360 = vrot.lane.b32.xlu1 %v3110_v53, %s2123_s8 }
 0x23e   : > { %v3134_v46 = vadd.f32 %v1130_v33, %v2985_v10  ;;  %v3137_v21 = vadd.f32 %v1131_v52, %v2983_v2 }
 0x241   : > { %v1099_v11 = vpop.permute.xlu0 %1098 }
 0x242   : > { %v3151_v10 = vsel %vm381_vm2, %v1097_v30, %v1099_v11  ;;  %v3154_v2 = vsel %vm381_vm2, %v1099_v11, %v1083_v54  ;;  %v1143_v16 = vpop.permute.xlu1 %1142  ;;  %v3174_v30 = vld [vmem:[%s3825_s2 + $0x58] sm:$0xff] }
 0x243   : > { %v1128_v28 = vmul.f32 %v1124_v47, %v3151_v10  ;;  %v1129_v20 = vmul.f32 %v1125_v45, %v3154_v2  ;;  %v1174_v12 = vsel %vm436_vm3, %v1143_v16, %v3087_v41 }
 0x244   : > { %1364 = vrot.lane.b32.xlu0 %v3148_v6, %s2123_s8  ;;  %v1180_v51 = vmul.f32 %v1176_v36, %v1174_v12  ;;  %1408 = vrot.lane.b32.xlu2 %v3083_v23, %s2124_s9 }
 0x245   : > { %v1136_v25 = vadd.f32 %v1128_v28, %v2958_v26  ;;  %v1137_v42 = vadd.f32 %v1129_v20, %v2930_v60  ;;  %1402 = vrot.lane.b32.xlu1 %v3056_v49, %s2124_s9  ;;  %v1200_v60 = vmul.f32 %v1196_v1, %v2987_v13  ;;  %v1179_v26 = vperm.slane %v3174_v30, 0 }
 0x246   : > { %v1188_v58 = vadd.f32 %v1180_v51, %v1134_v61  ;;  %v1199_v13 = vperm.slane %v3174_v30, 1 }
 0x247   : > { %v1187_v29 = vmul.f32 %v1179_v26, %v1165_v19  ;;  %v3208_v19 = vld [vmem:[%s3825_s2 + $0x50] sm:$0xff] }
 0x248   : > { %v3180_v54 = vadd.f32 %v1200_v60, %v1188_v58  ;;  %v1178_v14 = vperm.slane %v3208_v19, 0  ;;  %v1198_v51 = vperm.slane %v3208_v19, 1 }
 0x249   : > { %v1105_v37 = vpop.permute.xlu0 %1104 }
 0x24a   : > { %v3183_v7 = vsel %vm381_vm2, %v1103_v24, %v1105_v37  ;;  %v3186_v39 = vsel %vm381_vm2, %v1105_v37, %v1085_v27  ;;  %v1153_v5 = vpop.permute.xlu1 %1152  ;;  %v3203_v27 = vld [vmem:[%s3825_s2 + $0x48] sm:$0xff] }
 0x24b   : > { %v1132_v55 = vmul.f32 %v1124_v47, %v3183_v7  ;;  %v1133_v61 = vmul.f32 %v1125_v45, %v3186_v39  ;;  %v1162_v43 = vsel %vm436_vm3, %v1153_v5, %v1143_v16  ;;  %v1177_v52 = vperm.slane %v3203_v27, 0 }
 0x24c   : > { %1410 = vrot.lane.b32.xlu0 %v3074_v48, %s2124_s9  ;;  %v1183_v57 = vmul.f32 %v1179_v26, %v1162_v43  ;;  %1404 = vrot.lane.b32.xlu2 %v3114_v38, %s2124_s9  ;;  %v1197_v20 = vperm.slane %v3203_v27, 1 }
 0x24d   : > { %v1140_v59 = vadd.f32 %v1132_v55, %v2940_v0  ;;  %v1141_v24 = vadd.f32 %v1133_v61, %v2942_v50  ;;  %1412 = vrot.lane.b32.xlu1 %v3070_v34, %s2124_s9  ;;  %v1203_v0 = vmul.f32 %v1199_v13, %v2991_v31  ;;  %v1221_v61 = vpop.permute.xlu2 %1220 }
 0x24e   : > { %v1191_v33 = vadd.f32 %v1183_v57, %v1137_v42 }
 0x24f   : > { %v3213_v50 = vadd.f32 %v1187_v29, %v1141_v24  ;;  %v1271_v24 = vperm.slane %v3203_v27, 3 }
 0x250   : > { %v3217_v45 = vadd.f32 %v1203_v0, %v1191_v33 }
 0x251   : > { %v1151_v47 = vpop.permute.xlu0 %1150 }
 0x252   : > { %v1160_v11 = vsel %vm436_vm3, %v3087_v41, %v1151_v47  ;;  %v1161_v16 = vsel %vm436_vm3, %v1151_v47, %v1153_v5  ;;  %v1157_v28 = vpop.permute.xlu1 %1156  ;;  %v1201_v41 = vmul.f32 %v1197_v20, %v2989_v44  ;;  %v1251_v44 = vperm.slane %v3203_v27, 2 }
 0x253   : > { %v1181_v12 = vmul.f32 %v1177_v52, %v1160_v11  ;;  %v1182_v31 = vmul.f32 %v1178_v14, %v1161_v16  ;;  %v1164_v42 = vsel %vm436_vm3, %v1157_v28, %v3108_v17  ;;  %v1202_v17 = vmul.f32 %v1198_v51, %v3017_v32 }
 0x254   : > { %v1186_v58 = vmul.f32 %v1178_v14, %v1164_v42  ;;  %1414 = vrot.lane.b32.xlu0 %v3110_v53, %s2124_s9  ;;  %1418 = vrot.lane.b32.xlu2 %v3148_v6, %s2124_s9 }
 0x255   : > { %v1189_v60 = vadd.f32 %v1181_v12, %v3103_v18  ;;  %v1190_v26 = vadd.f32 %v1182_v31, %v1136_v25  ;;  %1416 = vrot.lane.b32.xlu1 %v3112_v35, %s2124_s9  ;;  %v1227_v11 = vpop.permute.xlu2 %1226 }
 0x256   : > { %v3239_v37 = vadd.f32 %v1186_v58, %v1140_v59 }
 0x257   : > { %v1209_v5 = vadd.f32 %v1201_v41, %v1189_v60  ;;  %v1210_v55 = vadd.f32 %v1202_v17, %v1190_v26  ;;  %v1252_v26 = vperm.slane %v3208_v19, 2  ;;  %v1253_v17 = vperm.slane %v3174_v30, 2 }
 0x259   : > { %v1155_v29 = vpop.permute.xlu0 %1154 }
 0x25a   : > { %v1163_v18 = vsel %vm436_vm3, %v1155_v29, %v1157_v28  ;;  %v1175_v25 = vsel %vm436_vm3, %v3091_v9, %v1155_v29  ;;  %v1219_v43 = vpop.permute.xlu1 %1218  ;;  %v1275_v9 = vmul.f32 %v1271_v24, %v3151_v10  ;;  %v1204_v28 = vmul.f32 %v1196_v1, %v3008_v15 }
 0x25b   : > { %v1184_v57 = vmul.f32 %v1176_v36, %v1175_v25  ;;  %v1185_v32 = vmul.f32 %v1177_v52, %v1163_v18  ;;  %v1233_v59 = vsel %vm509_vm4, %v1219_v43, %v1221_v61  ;;  %v1250_v52 = vperm.slane %v3145_v40, 2 }
 0x25c   : > { %1476 = vrot.lane.b32.xlu0 %v3083_v23, %s2125_s10  ;;  %v1255_v14 = vmul.f32 %v1251_v44, %v1233_v59  ;;  %1480 = vrot.lane.b32.xlu2 %v3070_v34, %s2125_s10 }
 0x25d   : > { %v1192_v0 = vadd.f32 %v1184_v57, %v3134_v46  ;;  %v1193_v33 = vadd.f32 %v1185_v32, %v3137_v21  ;;  %1478 = vrot.lane.b32.xlu1 %v3074_v48, %s2125_s10  ;;  %v1270_v46 = vperm.slane %v3145_v40, 3 }
 0x25e   : > { %v1263_v36 = vadd.f32 %v1255_v14, %v1209_v5 }
 0x25f   : > { %v1212_v10 = vadd.f32 %v1204_v28, %v1192_v0  ;;  %v1274_v41 = vmul.f32 %v1270_v46, %v3094_v56  ;;  %v1278_v15 = vmul.f32 %v1270_v46, %v3120_v8  ;;  %v1273_v56 = vperm.slane %v3174_v30, 3 }
 0x260   : > { %v3264_v21 = vadd.f32 %v1275_v9, %v1263_v36  ;;  %v1207_v8 = vmul.f32 %v1199_v13, %v2896_v3 }
 0x261   : > { %v1217_v47 = vpop.permute.xlu0 %1216  ;;  %v1277_v36 = vmul.f32 %v1273_v56, %v3097_v62  ;;  %v1281_v3 = vmul.f32 %v1273_v56, %v3123_v63  ;;  %v1205_v62 = vmul.f32 %v1197_v20, %v3005_v4  ;;  %v1279_v4 = vmul.f32 %v1271_v24, %v3183_v7 }
 0x262   : > { %v1232_v16 = vsel %vm509_vm4, %v1217_v47, %v1219_v43  ;;  %v1225_v12 = vpop.permute.xlu1 %1224  ;;  %v1215_v14 = vadd.f32 %v1207_v8, %v3213_v50 }
 0x263   : > { %v1254_v31 = vmul.f32 %v1250_v52, %v1232_v16  ;;  %v1235_v42 = vsel %vm509_vm4, %v1225_v12, %v1227_v11  ;;  %v1213_v63 = vadd.f32 %v1205_v62, %v1193_v33 }
 0x264   : > { %v1258_v58 = vmul.f32 %v1250_v52, %v1235_v42  ;;  %1482 = vrot.lane.b32.xlu0 %v3056_v49, %s2125_s10  ;;  %1486 = vrot.lane.b32.xlu2 %v3112_v35, %s2125_s10 }
 0x265   : > { %v1262_v60 = vadd.f32 %v1254_v31, %v3180_v54  ;;  %1484 = vrot.lane.b32.xlu1 %v3110_v53, %s2125_s10  ;;  %v1272_v54 = vperm.slane %v3208_v19, 3 }
 0x266   : > { %v1266_v1 = vadd.f32 %v1258_v58, %v1212_v10 }
 0x267   : > { %v3282_v5 = vadd.f32 %v1274_v41, %v1262_v60  ;;  %v1280_v20 = vmul.f32 %v1272_v54, %v3186_v39 }
 0x268   : > { %v3284_v29 = vadd.f32 %v1278_v15, %v1266_v1 }
 0x269   : > { %v1223_v18 = vpop.permute.xlu0 %1222 }
 0x26a   : > { %v1234_v25 = vsel %vm509_vm4, %v1221_v61, %v1223_v18  ;;  %v1248_v43 = vsel %vm509_vm4, %v1223_v18, %v1217_v47  ;;  %v1231_v57 = vpop.permute.xlu1 %1230  ;;  %v1276_v61 = vmul.f32 %v1272_v54, %v3154_v2  ;;  %v1206_v2 = vmul.f32 %v1198_v51, %v3027_v22 }
 0x26b   : > { %v1256_v32 = vmul.f32 %v1252_v26, %v1234_v25  ;;  %v1257_v59 = vmul.f32 %v1253_v17, %v1248_v43  ;;  %v1249_v0 = vsel %vm509_vm4, %v1231_v57, %v1225_v12  ;;  %v1385_v18 = vperm.slane %v3174_v30, 4 }
 0x26c   : > { %v1261_v9 = vmul.f32 %v1253_v17, %v1249_v0  ;;  %1488 = vrot.lane.b32.xlu0 %v3148_v6, %s2125_s10  ;;  %v1214_v12 = vadd.f32 %v1206_v2, %v3239_v37  ;;  %v1384_v25 = vperm.slane %v3208_v19, 4  ;;  %v1439_v43 = vperm.slane %v3174_v30, 5 }
 0x26d   : > { %v1264_v52 = vadd.f32 %v1256_v32, %v1210_v55  ;;  %v1265_v46 = vadd.f32 %v1257_v59, %v3217_v45  ;;  %1490 = vrot.lane.b32.xlu1 %v3114_v38, %s2125_s10 }
 0x26e   : > { %v1269_v13 = vadd.f32 %v1261_v9, %v1215_v14 }
 0x26f   : > { %v3303_v47 = vadd.f32 %v1277_v36, %v1265_v46  ;;  %v3305_v50 = vadd.f32 %v1276_v61, %v1264_v52 }
 0x270   : > { %v1289_v16 = vadd.f32 %v1281_v3, %v1269_v13  ;;  %v1459_v3 = vperm.slane %v3174_v30, 6 }
 0x271   : > { %v1229_v45 = vpop.permute.xlu0 %1228 }
 0x272   : > { %v1236_v55 = vsel %vm509_vm4, %v1227_v11, %v1229_v45  ;;  %v1237_v28 = vsel %vm509_vm4, %v1229_v45, %v1231_v57  ;;  %v1343_v11 = vpop.permute.xlu2 %1342  ;;  %v1357_v37 = vpop.permute.xlu1 %1356  ;;  %v1467_v62 = vmul.f32 %v1459_v3, %v3114_v38  ;;  %v1382_v45 = vperm.slane %v3145_v40, 4 }
 0x273   : > { %v1259_v31 = vmul.f32 %v1251_v44, %v1236_v55  ;;  %v1260_v42 = vmul.f32 %v1252_v26, %v1237_v28  ;;  %v1383_v44 = vperm.slane %v3203_v27, 4  ;;  %v1437_v38 = vperm.slane %v3203_v27, 5 }
 0x275   : > { %v1267_v10 = vadd.f32 %v1259_v31, %v1213_v63  ;;  %v1268_v22 = vadd.f32 %v1260_v42, %v1214_v12  ;;  %v1456_v12 = vperm.slane %v3145_v40, 6  ;;  %v1436_v31 = vperm.slane %v3145_v40, 5 }
 0x276   : > { %v1457_v42 = vperm.slane %v3203_v27, 6 }
 0x277   : > { %v1287_v51 = vadd.f32 %v1279_v4, %v1267_v10  ;;  %v1288_v58 = vadd.f32 %v1280_v20, %v1268_v22  ;;  %v1458_v4 = vperm.slane %v3208_v19, 6 }
 0x279   : > { %v1355_v15 = vpop.permute.xlu0 %1354 }
 0x27a   : > { %v1359_v41 = vpop.permute.xlu2 %1358  ;;  %v3354_v28 = vsel %vm381_vm2, %v1355_v15, %v1357_v37 }
 0x27b   : > { %v1367_v20 = vsel %vm381_vm2, %v1357_v37, %v1359_v41 }
 0x296   : > { %v1363_v60 = vpop.permute.xlu2 %1362 }
 0x29e   : > { %v1409_v33 = vpop.permute.xlu2 %1408 }
 0x2a6   : > { %v1405_v1 = vpop.permute.xlu2 %1404 }
 0x2ae   : > { %v1345_v17 = vpop.permute.xlu0 %1344  ;;  %v1419_v26 = vpop.permute.xlu2 %1418 }
 0x2af   : > { %v1361_v56 = vpop.permute.xlu1 %1360  ;;  %v1425_v7 = vsel %vm436_vm3, %v1419_v26, %v1405_v1 }
 0x2b0   : > { %v3325_v39 = vsel %vm381_vm2, %v1361_v56, %v1363_v60  ;;  %v1447_v9 = vmul.f32 %v1439_v43, %v1425_v7  ;;  %v3348_v2 = vsel %vm381_vm2, %v1345_v17, %v1361_v56 }
 0x2b1   : > { %v1391_v24 = vmul.f32 %v1383_v44, %v3325_v39  ;;  %v1390_v63 = vmul.f32 %v1382_v45, %v3348_v2 }
 0x2b3   : > { %v1399_v54 = vadd.f32 %v1391_v24, %v1287_v51  ;;  %v1398_v24 = vadd.f32 %v1390_v63, %v3284_v29 }
 0x2b6   : > { %v1365_v8 = vpop.permute.xlu0 %1364 }
 0x2b7   : > { %v3332_v57 = vsel %vm381_vm2, %v1363_v60, %v1365_v8  ;;  %v3335_v32 = vsel %vm381_vm2, %v1365_v8, %v1345_v17  ;;  %v1403_v59 = vpop.permute.xlu1 %1402  ;;  %v1438_v17 = vperm.slane %v3208_v19, 5 }
 0x2b8   : > { %v1392_v0 = vmul.f32 %v1384_v25, %v3332_v57  ;;  %v1393_v14 = vmul.f32 %v1385_v18, %v3335_v32  ;;  %v1434_v10 = vsel %vm436_vm3, %v1403_v59, %v1409_v33 }
 0x2ba   : > { %v1400_v36 = vadd.f32 %v1392_v0, %v1288_v58  ;;  %v1401_v61 = vadd.f32 %v1393_v14, %v1289_v16  ;;  %v3357_v16 = vsel %vm381_vm2, %v1343_v11, %v1355_v15  ;;  %v1464_v58 = vmul.f32 %v1456_v12, %v3110_v53 }
 0x2bb   : > { %v1386_v60 = vmul.f32 %v1382_v45, %v3357_v16  ;;  %v1387_v15 = vmul.f32 %v1383_v44, %v3354_v28  ;;  %v1388_v44 = vmul.f32 %v1384_v25, %v1367_v20 }
 0x2bc   : > { %v1455_v52 = vadd.f32 %v1447_v9, %v1401_v61  ;;  %v3377_v61 = vsel %vm381_vm2, %v1359_v41, %v1343_v11 }
 0x2bd   : > { %v1395_v29 = vadd.f32 %v1387_v15, %v3264_v21 }
 0x2be   : > { %v1411_v46 = vpop.permute.xlu0 %1410  ;;  %v3351_v55 = vadd.f32 %v1467_v62, %v1455_v52  ;;  %v1465_v62 = vmul.f32 %v1457_v42, %v3112_v35  ;;  %v3391_v35 = vld [vmem:[%s3825_s2 + $0x68] ss:$0 sm:$0xff] }
 0x2bf   : > { %v1413_v13 = vpop.permute.xlu1 %1412  ;;  %v1420_v22 = vsel %vm436_vm3, %v1409_v33, %v1411_v46  ;;  %v1440_v33 = vmul.f32 %v1436_v31, %v1434_v10  ;;  %v1481_v10 = vpop.permute.xlu2 %1480 }
 0x2c0   : > { %v1441_v14 = vmul.f32 %v1437_v38, %v1420_v22  ;;  %v1422_v25 = vsel %vm436_vm3, %v1413_v13, %v1403_v59  ;;  %v2086_v59 = vld [vmem:[%s3825_s2 + $0x60] ss:$0 sm:$0xff] }
 0x2c2   : > { %v1449_v41 = vadd.f32 %v1441_v14, %v1395_v29  ;;  %v1512_v14 = vperm.slane %v3208_v19, 7 }
 0x2c6   : > { %v1415_v51 = vpop.permute.xlu0 %1414 }
 0x2c7   : > { %v1435_v56 = vsel %vm436_vm3, %v1405_v1, %v1415_v51  ;;  %v1417_v7 = vpop.permute.xlu1 %1416  ;;  %v1394_v1 = vadd.f32 %v1386_v60, %v3282_v5  ;;  %v1460_v5 = vmul.f32 %v1456_v12, %v3083_v23  ;;  %v1443_v60 = vmul.f32 %v1439_v43, %v1422_v25 }
 0x2c8   : > { %v1444_v8 = vmul.f32 %v1436_v31, %v1435_v56  ;;  %v1423_v37 = vsel %vm436_vm3, %v1415_v51, %v1417_v7  ;;  %v1424_v0 = vsel %vm436_vm3, %v1417_v7, %v1419_v26  ;;  %v1421_v51 = vsel %vm436_vm3, %v1411_v46, %v1413_v13 }
 0x2c9   : > { %v1445_v9 = vmul.f32 %v1437_v38, %v1423_v37  ;;  %v1446_v53 = vmul.f32 %v1438_v17, %v1424_v0  ;;  %v1510_v26 = vperm.slane %v3145_v40, 7  ;;  %v1511_v31 = vperm.slane %v3203_v27, 7 }
 0x2ca   : > { %v1452_v52 = vadd.f32 %v1444_v8, %v1398_v24  ;;  %v1448_v11 = vadd.f32 %v1440_v33, %v1394_v1  ;;  %v1466_v40 = vmul.f32 %v1458_v4, %v3148_v6  ;;  %v1442_v46 = vmul.f32 %v1438_v17, %v1421_v51 }
 0x2cb   : > { %v1453_v45 = vadd.f32 %v1445_v9, %v1399_v54  ;;  %v1454_v63 = vadd.f32 %v1446_v53, %v1400_v36  ;;  %v1389_v54 = vmul.f32 %v1385_v18, %v3377_v61  ;;  %v1396_v36 = vadd.f32 %v1388_v44, %v3305_v50  ;;  %v1487_v53 = vpop.permute.xlu2 %1486 }
 0x2cc   : > { %v1472_v38 = vadd.f32 %v1464_v58, %v1452_v52  ;;  %v1461_v13 = vmul.f32 %v1457_v42, %v3074_v48  ;;  %v1468_v18 = vadd.f32 %v1460_v5, %v1448_v11  ;;  %v1535_v17 = vmul.f32 %v3391_v35, %v1367_v20 }
 0x2cd   : > { %v3386_v22 = vadd.f32 %v1465_v62, %v1453_v45  ;;  %v3407_v12 = vadd.f32 %v1466_v40, %v1454_v63  ;;  %v1397_v48 = vadd.f32 %v1389_v54, %v3303_v47  ;;  %v1534_v42 = vmul.f32 %v2086_v59, %v3354_v28  ;;  %v3424_v47 = vld [vmem:[%s3825_s2 + $0x70] ss:$0 sm:$0xff]  ;;  %v3440_v62 = vld [vmem:[%s3825_s2 + $0x78] ss:$0 sm:$0xff] }
 0x2ce   : > { %v1477_v21 = vpop.permute.xlu0 %1476  ;;  %v1469_v15 = vadd.f32 %v1461_v13, %v1449_v41  ;;  %v1450_v7 = vadd.f32 %v1442_v46, %v1396_v36  ;;  %v1462_v37 = vmul.f32 %v1458_v4, %v3070_v34  ;;  %v1513_v9 = vperm.slane %v3174_v30, 7 }
 0x2cf   : > { %v1479_v58 = vpop.permute.xlu1 %1478  ;;  %v1451_v8 = vadd.f32 %v1443_v60, %v1397_v48  ;;  %v1463_v28 = vmul.f32 %v1459_v3, %v3056_v49  ;;  %v1537_v54 = vmul.f32 %v3440_v62, %v3357_v16  ;;  %v1538_v36 = vmul.f32 %v2086_v59, %v3325_v39 }
 0x2d0   : > { %v1492_v23 = vsel %vm509_vm4, %v1477_v21, %v1479_v58  ;;  %v1493_v6 = vsel %vm509_vm4, %v1479_v58, %v1481_v10  ;;  %v1470_v44 = vadd.f32 %v1462_v37, %v1450_v7 }
 0x2d1   : > { %v1514_v50 = vmul.f32 %v1510_v26, %v1492_v23  ;;  %v1515_v56 = vmul.f32 %v1511_v31, %v1493_v6  ;;  %v1471_v1 = vadd.f32 %v1463_v28, %v1451_v8 }
 0x2d3   : > { %v1522_v43 = vadd.f32 %v1514_v50, %v1468_v18  ;;  %v1523_v24 = vadd.f32 %v1515_v56, %v1469_v15 }
 0x2d5   : > { %v3415_v0 = vadd.f32 %v1534_v42, %v1522_v43  ;;  %v3417_v33 = vadd.f32 %v1535_v17, %v1523_v24 }
 0x2d6   : > { %v1483_v20 = vpop.permute.xlu0 %1482 }
 0x2d7   : > { %v3430_v34 = vmul.f32 0.70710677, %v3415_v0  ;;  %v3433_v4 = vmul.f32 0.70710677, %v3417_v33  ;;  %v3435_v52 = vpop.permute.xlu1 %1484  ;;  %v1494_v29 = vsel %vm509_vm4, %v1481_v10, %v1483_v20  ;;  %v1508_v49 = vsel %vm509_vm4, %v1483_v20, %v1477_v21 }
 0x2d8   : > { %v1495_v3 = vsel %vm509_vm4, %v3435_v52, %v1487_v53  ;;  %v1516_v51 = vmul.f32 %v1512_v14, %v1494_v29  ;;  %v1517_v11 = vmul.f32 %v1513_v9, %v1508_v49  ;;  %v1536_v10 = vmul.f32 %v3424_v47, %v3377_v61 }
 0x2d9   : > { %v1566_v45 = vmul.f32 %v3430_v34, %v3430_v34  ;;  %v1606_v63 = vmul.f32 %v3433_v4, %v3433_v4  ;;  %v1518_v41 = vmul.f32 %v1510_v26, %v1495_v3  ;;  %v3471_v26 = vld [vmem:[%s3826_s3] sm:$0x77] }
 0x2da   : > { %v1524_v5 = vadd.f32 %v1516_v51, %v1470_v44  ;;  %v1525_v40 = vadd.f32 %v1517_v11, %v1471_v1  ;;  %v1902_v23 = vperm.slane %v3471_v26, 1  ;;  %v1903_v50 = vperm.slane %v3471_v26, 5 }
 0x2db   : > { %v3456_v25 = vmin.f32 %v1566_v45, 16.0  ;;  %v3458_v21 = vmin.f32 %v1606_v63, 16.0  ;;  %v1526_v46 = vadd.f32 %v1518_v41, %v1472_v38  ;;  %v1922_v56 = vperm.slane %v3471_v26, 2 }
 0x2dc   : > { %v3466_v61 = vadd.f32 %v1536_v10, %v1524_v5  ;;  %v3475_v6 = vadd.f32 %v1537_v54, %v1525_v40  ;;  %v1923_v8 = vperm.slane %v3471_v26, 6  ;;  %v3498_v49 = vperm.slane %v1902_v23, 1 }
 0x2dd   : > { %v1568_v13 = vmul.f32 2.1237322e-06, %v3456_v25  ;;  %v1579_v58 = vmul.f32 3.8918573e-05, %v3456_v25  ;;  %v1608_v60 = vmul.f32 2.1237322e-06, %v3458_v21  ;;  %v3477_v39 = vadd.f32 %v1538_v36, %v1526_v46 }
 0x2de   : > { %v1619_v16 = vmul.f32 3.8918573e-05, %v3458_v21  ;;  %v3479_v38 = vpop.permute.xlu0 %1488  ;;  %v3484_v48 = vmul.f32 0.70710677, %v3466_v61  ;;  %v3494_v28 = vmul.f32 0.70710677, %v3475_v6  ;;  %v1539_v26 = vmul.f32 %v3391_v35, %v3332_v57 }
 0x2df   : > { %v1569_v59 = vadd.f32 0.00028619796, %v1568_v13  ;;  %v1580_v18 = vadd.f32 0.001143296, %v1579_v58  ;;  %v1609_v15 = vadd.f32 0.00028619796, %v1608_v60  ;;  %v1496_v24 = vsel %vm509_vm4, %v1487_v53, %v3479_v38 }
 0x2e0   : > { %v1620_v17 = vadd.f32 0.001143296, %v1619_v16  ;;  %v1646_v20 = vmul.f32 %v3484_v48, %v3484_v48  ;;  %v1519_v53 = vmul.f32 %v1511_v31, %v1496_v24  ;;  %v3508_v10 = vmul.f32 0.70710677, %v3477_v39 }
 0x2e1   : > { %v1570_v42 = vmul.f32 %v1569_v59, %v3456_v25  ;;  %v1581_v7 = vmul.f32 %v1580_v18, %v3456_v25  ;;  %v1610_v43 = vmul.f32 %v1609_v15, %v3458_v21  ;;  %v1686_v54 = vmul.f32 %v3494_v28, %v3494_v28 }
 0x2e2   : > { %v1621_v37 = vmul.f32 %v1620_v17, %v3458_v21  ;;  %v3500_v45 = vmin.f32 %v1646_v20, 16.0  ;;  %v1527_v46 = vadd.f32 %v1519_v53, %v3386_v22  ;;  %v3530_v57 = vmul.f32 %v3440_v62, %v3348_v2 }
 0x2e3   : > { %v1571_v44 = vadd.f32 0.0036580483, %v1570_v42  ;;  %v1582_v1 = vadd.f32 0.014752088, %v1581_v7  ;;  %v1611_v29 = vadd.f32 0.0036580483, %v1610_v43  ;;  %v1726_v20 = vmul.f32 %v3508_v10, %v3508_v10 }
 0x2e4   : > { %v1622_v3 = vadd.f32 0.014752088, %v1621_v37  ;;  %v1648_v5 = vmul.f32 2.1237322e-06, %v3500_v45  ;;  %v1659_v40 = vmul.f32 3.8918573e-05, %v3500_v45  ;;  %v3526_v24 = vadd.f32 %v1539_v26, %v1527_v46 }
 0x2e5   : > { %v1572_v63 = vmul.f32 %v1571_v44, %v3456_v25  ;;  %v1583_v51 = vmul.f32 %v1582_v1, %v3456_v25  ;;  %v1612_v11 = vmul.f32 %v1611_v29, %v3458_v21  ;;  %v3524_v42 = vmin.f32 %v1686_v54, 16.0  ;;  %v1491_v54 = vpop.permute.xlu1 %1490 }
 0x2e6   : > { %v1623_v41 = vmul.f32 %v1622_v3, %v3458_v21  ;;  %v1649_v58 = vadd.f32 0.00028619796, %v1648_v5  ;;  %v1660_v60 = vadd.f32 0.001143296, %v1659_v40  ;;  %v3532_v35 = vperm.slane %v1903_v50, 1 }
 0x2e7   : > { %v1573_v27 = vadd.f32 0.05243302, %v1572_v63  ;;  %v1584_v31 = vadd.f32 0.112945676, %v1583_v51  ;;  %v1613_v36 = vadd.f32 0.05243302, %v1612_v11  ;;  %v3544_v62 = vmul.f32 %v3424_v47, %v3335_v32 }
 0x2e8   : > { %v1624_v13 = vadd.f32 0.112945676, %v1623_v41  ;;  %v1650_v15 = vmul.f32 %v1649_v58, %v3500_v45  ;;  %v1661_v17 = vmul.f32 %v1660_v60, %v3500_v45  ;;  %v1688_v51 = vmul.f32 2.1237322e-06, %v3524_v42  ;;  %v3584_v58 = vld [vmem:[%s3826_s3 + $0x8] sm:$0x77] }
 0x2e9   : > { %v1574_v23 = vmul.f32 %v1573_v27, %v3456_v25  ;;  %v1585_v16 = vmul.f32 %v1584_v31, %v3456_v25  ;;  %v1614_v59 = vmul.f32 %v1613_v36, %v3458_v21  ;;  %v1699_v2 = vmul.f32 3.8918573e-05, %v3524_v42 }
 0x2ea   : > { %v1625_v18 = vmul.f32 %v1624_v13, %v3458_v21  ;;  %v1651_v29 = vadd.f32 0.0036580483, %v1650_v15  ;;  %v1662_v3 = vadd.f32 0.014752088, %v1661_v17  ;;  %v3546_v50 = vperm.slane %v1922_v56, 2 }
 0x2eb   : > { %v1575_v22 = vadd.f32 0.18741608, %v1574_v23  ;;  %v1586_v7 = vadd.f32 0.4994258, %v1585_v16  ;;  %v1615_v43 = vadd.f32 0.18741608, %v1614_v59  ;;  %v3574_v36 = vsel %vm509_vm4, %v3479_v38, %v1491_v54 }
 0x2ec   : > { %v1626_v37 = vadd.f32 0.4994258, %v1625_v18  ;;  %v3548_v11 = vperm.slane %v1923_v8, 2  ;;  %v3556_v5 = vmul.f32 0.5, %v3417_v33  ;;  %v3560_v40 = vmin.f32 %v1726_v20, 16.0 }
 0x2ed   : > { %v1576_v44 = vmul.f32 %v1575_v22, %v3456_v25  ;;  %v1587_v1 = vmul.f32 %v1586_v7, %v3456_v25  ;;  %v1616_v53 = vmul.f32 %v1615_v43, %v3458_v21  ;;  %v3553_v25 = vmul.f32 0.5, %v3415_v0 }
 0x2ee   : > { %v1627_v63 = vmul.f32 %v1626_v37, %v3458_v21  ;;  %v1652_v32 = vmul.f32 %v1651_v29, %v3500_v45  ;;  %v1663_v47 = vmul.f32 %v1662_v3, %v3500_v45  ;;  %v1689_v0 = vadd.f32 0.00028619796, %v1688_v51 }
 0x2ef   : > { %v3550_v41 = vadd.f32 1.0, %v1587_v1  ;;  %v1577_v27 = vadd.f32 1.1283791, %v1576_v44  ;;  %v1617_v56 = vadd.f32 1.1283791, %v1616_v53  ;;  %v3567_v33 = vmul.f32 0.5, %v3466_v61 }
 0x2f0   : > { %v3558_v21 = vadd.f32 1.0, %v1627_v63  ;;  %v1700_v8 = vadd.f32 0.001143296, %v1699_v2  ;;  %v3570_v31 = vmul.f32 0.5, %v3475_v6  ;;  %v3578_v46 = vsel %vm509_vm4, %v1491_v54, %v3435_v52 }
 0x2f1   : > { %2088 = vrcp.f32 %v3550_v41  ;;  %v1598_v13 = vand.u32 2147483647, %v3550_v41  ;;  %v1904_v61 = vperm.slane %v3584_v58, 1  ;;  %v1905_v6 = vperm.slane %v3584_v58, 5 }
 0x2f2   : > { %2090 = vrcp.f32 %v3558_v21  ;;  %v1924_v60 = vperm.slane %v3584_v58, 2  ;;  %v1578_v38 = vmul.f32 %v1577_v27, %v3430_v34  ;;  %v1600_v26 = vand.u32 2147483648, %v3550_v41 }
 0x2f3   : > { %v1653_v23 = vadd.f32 0.05243302, %v1652_v32  ;;  %v1664_v52 = vadd.f32 0.112945676, %v1663_v47  ;;  %vm1594_vm7 = vweird.f32 %v3550_v41  ;;  %v1618_v16 = vmul.f32 %v1617_v56, %v3433_v4 }
 0x2f4   : > { %v1690_v59 = vmul.f32 %v1689_v0, %v3524_v42  ;;  %v1701_v18 = vmul.f32 %v1700_v8, %v3524_v42  ;;  %v1728_v15 = vmul.f32 2.1237322e-06, %v3560_v40  ;;  %vm1634_vm8 = vweird.f32 %v3558_v21 }
 0x2f5   : > { %v1654_v22 = vmul.f32 %v1653_v23, %v3500_v45  ;;  %v1665_v34 = vmul.f32 %v1664_v52, %v3500_v45  ;;  %v1739_v7 = vmul.f32 3.8918573e-05, %v3560_v40  ;;  %vm3601_vm9 = vcmp.eq.f32.partialorder %v1598_v13, 8.507059e+37 }
 0x2f6   : > { %v1638_v20 = vand.u32 2147483647, %v3558_v21  ;;  %v1691_v44 = vadd.f32 0.0036580483, %v1690_v59  ;;  %v1702_v1 = vadd.f32 0.014752088, %v1701_v18 }
 0x2f7   : > { %v2089_v17 = vpop.eup %2088  ;;  %v1640_v3 = vand.u32 2147483648, %v3558_v21  ;;  %v1655_v53 = vadd.f32 0.18741608, %v1654_v22  ;;  %v1666_v63 = vadd.f32 0.4994258, %v1665_v34  ;;  %v1601_v52 = vor.u32 1.1754944e-38, %v1600_v26 }
 0x2f8   : > { %v2091_v43 = vpop.eup %2090  ;;  %v1590_v37 = vmul.f32 %v2089_v17, %v3550_v41  ;;  %v1692_v2 = vmul.f32 %v1691_v44, %v3524_v42  ;;  %v1703_v54 = vmul.f32 %v1702_v1, %v3524_v42  ;;  %v1729_v27 = vadd.f32 0.00028619796, %v1728_v15 }
 0x2f9   : > { %v1630_v29 = vmul.f32 %v2091_v43, %v3558_v21  ;;  %vm1595_vm10 = vweird.f32 %v2089_v17  ;;  %v1667_v47 = vmul.f32 %v1666_v63, %v3500_v45  ;;  %v1740_v56 = vadd.f32 0.001143296, %v1739_v7 }
 0x2fa   : > { %v1591_v51 = vsub.f32 1.0, %v1590_v37  ;;  %v1693_v8 = vadd.f32 0.05243302, %v1692_v2  ;;  %v1704_v13 = vadd.f32 0.112945676, %v1703_v54  ;;  %v1730_v23 = vmul.f32 %v1729_v27, %v3560_v40  ;;  %vm1596_vm12 = vmor %vm1594_vm7, %vm1595_vm10 }
 0x2fb   : > { %v1631_v32 = vsub.f32 1.0, %v1630_v29  ;;  %vm1635_vm11 = vweird.f32 %v2091_v43  ;;  %v3612_v18 = vadd.f32 1.0, %v1667_v47  ;;  %v1656_v34 = vmul.f32 %v1655_v53, %v3500_v45 }
 0x2fc   : > { %v1592_v0 = vmul.f32 %v2089_v17, %v1591_v51  ;;  %v1705_v15 = vmul.f32 %v1704_v13, %v3524_v42  ;;  %v1731_v37 = vadd.f32 0.0036580483, %v1730_v23  ;;  %vm1639_vm13 = vcmp.eq.f32.partialorder %v1638_v20, 8.507059e+37  ;;  %vm1636_vm14 = vmor %vm1634_vm8, %vm1635_vm11 }
 0x2fd   : > { %v1632_v59 = vmul.f32 %v2091_v43, %v1631_v32  ;;  %2092 = vrcp.f32 %v3612_v18  ;;  %v1694_v26 = vmul.f32 %v1693_v8, %v3524_v42  ;;  %v1641_v1 = vor.u32 1.1754944e-38, %v1640_v3 }
 0x2fe   : > { %v1593_v22 = vadd.f32 %v2089_v17, %v1592_v0  ;;  %v1741_v45 = vmul.f32 %v1740_v56, %v3560_v40  ;;  %v3625_v29 = vmul.f32 0.70710677, %v3526_v24  ;;  %v1706_v63 = vadd.f32 0.4994258, %v1705_v15 }
 0x2ff   : > { %v1633_v7 = vadd.f32 %v2091_v43, %v1632_v59  ;;  %v1732_v20 = vmul.f32 %v1731_v37, %v3560_v40  ;;  %v1657_v54 = vadd.f32 1.1283791, %v1656_v34  ;;  %v1678_v3 = vand.u32 2147483647, %v3612_v18 }
 0x300   : > { %v1597_v44 = vsel %vm1596_vm12, %v2089_v17, %v1593_v22  ;;  %v1925_v17 = vperm.slane %v3584_v58, 6  ;;  %v1695_v27 = vadd.f32 0.18741608, %v1694_v26  ;;  %v1707_v32 = vmul.f32 %v1706_v63, %v3524_v42 }
 0x301   : > { %v1602_v41 = vsel %vm3601_vm9, %v1601_v52, %v1597_v44  ;;  %v1637_v53 = vsel %vm1636_vm14, %v2091_v43, %v1633_v7  ;;  %v3635_v4 = vperm.slane %v1904_v61, 1  ;;  %v1733_v43 = vadd.f32 0.05243302, %v1732_v20 }
 0x302   : > { %v1603_v51 = vmul.f32 %v1602_v41, %v1578_v38  ;;  %v1642_v2 = vsel %vm1639_vm13, %v1641_v1, %v1637_v53  ;;  %v1742_v56 = vadd.f32 0.014752088, %v1741_v45  ;;  %v1680_v8 = vand.u32 2147483648, %v3612_v18  ;;  %v1942_v53 = vld [vmem:[%s3652_s19] sm:$0xff] }
 0x303   : > { %v1643_v21 = vmul.f32 %v1642_v2, %v1618_v16  ;;  %v2093_v0 = vpop.eup %2092  ;;  %v3638_v13 = vadd.f32 1.0, %v1707_v32  ;;  %v1766_v16 = vmul.f32 %v3625_v29, %v3625_v29  ;;  %v1658_v52 = vmul.f32 %v1657_v54, %v3484_v48  ;;  %v1943_v2 = vld [vmem:[%s3652_s19 + $0x8] sm:$0xff] }
 0x304   : > { %v2056_v47 = vclamps-f32 %v1603_v51, 1.0  ;;  %v1670_v59 = vmul.f32 %v2093_v0, %v3612_v18  ;;  %v1743_v61 = vmul.f32 %v1742_v56, %v3560_v40  ;;  %vm1674_vm15 = vweird.f32 %v3612_v18 }
 0x305   : > { %v2057_v38 = vclamps-f32 %v1643_v21, 1.0  ;;  %v1696_v34 = vmul.f32 %v1695_v27, %v3524_v42  ;;  %2094 = vrcp.f32 %v3638_v13  ;;  %vm3655_vm0 = vcmp.eq.f32.partialorder %v1678_v3, 8.507059e+37 }
 0x306   : > { %v1886_v23 = vadd.f32 1.0, %v2056_v47  ;;  %v1671_v48 = vsub.f32 1.0, %v1670_v59  ;;  %v1734_v7 = vmul.f32 %v1733_v43, %v3560_v40  ;;  %v1681_v26 = vor.u32 1.1754944e-38, %v1680_v8 }
 0x307   : > { %v1887_v22 = vadd.f32 1.0, %v2057_v38  ;;  %v1744_v44 = vadd.f32 0.112945676, %v1743_v61  ;;  %v3661_v1 = vmin.f32 %v1766_v16, 16.0  ;;  %vm1675_vm1 = vweird.f32 %v2093_v0  ;;  %v3692_v16 = vld [vmem:[%s3652_s19 + $0x28] sm:$0xff] }
 0x308   : > { %v1894_v15 = vmul.f32 %v1886_v23, %v3553_v25  ;;  %v1672_v41 = vmul.f32 %v2093_v0, %v1671_v48  ;;  %v1520_v25 = vmul.f32 %v1512_v14, %v3574_v36  ;;  %v1697_v20 = vadd.f32 1.1283791, %v1696_v34  ;;  %vm1676_vm2 = vmor %vm1674_vm15, %vm1675_vm1  ;;  %v3684_v14 = vld [vmem:[%s3652_s19 + $0x20] sm:$0xff] }
 0x309   : > { %v1895_v42 = vmul.f32 %v1887_v22, %v3556_v5  ;;  %v1745_v5 = vmul.f32 %v1744_v44, %v3560_v40  ;;  %v1768_v51 = vmul.f32 2.1237322e-06, %v3661_v1  ;;  %v1735_v3 = vadd.f32 0.18741608, %v1734_v7 }
 0x30a   : > { %v1914_v45 = vmul.f32 %v3498_v49, %v1894_v15  ;;  %v1673_v21 = vadd.f32 %v2093_v0, %v1672_v41  ;;  %v1779_v27 = vmul.f32 3.8918573e-05, %v3661_v1  ;;  %v1521_v43 = vmul.f32 %v1513_v9, %v3578_v46 }
 0x30b   : > { %v1915_v63 = vmul.f32 %v3532_v35, %v1895_v42  ;;  %v2095_v32 = vpop.eup %2094  ;;  %v1746_v36 = vadd.f32 0.4994258, %v1745_v5  ;;  %v1769_v47 = vadd.f32 0.00028619796, %v1768_v51  ;;  %v1718_v8 = vand.u32 2147483647, %v3638_v13 }
 0x30c   : > { %v1934_v54 = vadd.f32 %v3546_v50, %v1914_v45  ;;  %v1677_v38 = vsel %vm1676_vm2, %v2093_v0, %v1673_v21  ;;  %v1710_v18 = vmul.f32 %v2095_v32, %v3638_v13  ;;  %v1720_v61 = vand.u32 2147483648, %v3638_v13 }
 0x30d   : > { %v1935_v19 = vadd.f32 %v3548_v11, %v1915_v63  ;;  %v1682_v59 = vsel %vm3655_vm0, %v1681_v26, %v1677_v38  ;;  %v1747_v22 = vmul.f32 %v1746_v36, %v3560_v40  ;;  %v1770_v9 = vmul.f32 %v1769_v47, %v3661_v1 }
 0x30e   : > { %v1950_v56 = vadd.f32 %v1942_v53, %v1934_v54  ;;  %v1683_v34 = vmul.f32 %v1682_v59, %v1658_v52  ;;  %v1711_v30 = vsub.f32 1.0, %v1710_v18  ;;  %v1780_v46 = vadd.f32 0.001143296, %v1779_v27 }
 0x30f   : > { %v1951_v23 = vadd.f32 %v1943_v2, %v1935_v19  ;;  %v1736_v0 = vmul.f32 %v1735_v3, %v3560_v40  ;;  %v3701_v15 = vadd.f32 1.0, %v1747_v22  ;;  %v1528_v48 = vadd.f32 %v1520_v25, %v3407_v12 }
 0x310   : > { %1958 = vst [vmem:[%s3681_s22] sm:$0xff] %v1950_v56  ;;  %v1529_v37 = vadd.f32 %v1521_v43, %v3351_v55  ;;  %v2058_v7 = vclamps-f32 %v1683_v34, 1.0  ;;  %v1712_v42 = vmul.f32 %v2095_v32, %v1711_v30  ;;  %vm1715_vm3 = vweird.f32 %v2095_v32 }
 0x311   : > { %1959 = vst [vmem:[%s3681_s22 + $0x8] sm:$0xff] %v1951_v23  ;;  %v1781_v26 = vmul.f32 %v1780_v46, %v3661_v1  ;;  %v3709_v52 = vperm.slane %v1924_v60, 2  ;;  %v1698_v44 = vmul.f32 %v1697_v20, %v3494_v28  ;;  %2096 = vrcp.f32 %v3701_v15 }
 0x312   : > { %v1771_v40 = vadd.f32 0.0036580483, %v1770_v9  ;;  %v1713_v45 = vadd.f32 %v2095_v32, %v1712_v42  ;;  %vm1714_vm4 = vweird.f32 %v3638_v13  ;;  %v1888_v12 = vadd.f32 1.0, %v2058_v7 }
 0x313   : > { %v1782_v41 = vadd.f32 0.014752088, %v1781_v26  ;;  %vm1716_vm5 = vmor %vm1714_vm4, %vm1715_vm3  ;;  %v1721_v55 = vor.u32 1.1754944e-38, %v1720_v61  ;;  %v1737_v25 = vadd.f32 1.1283791, %v1736_v0  ;;  %v3715_v53 = vadd.f32 %v3544_v62, %v1528_v48 }
 0x314   : > { %v3718_v60 = vadd.f32 %v3530_v57, %v1529_v37  ;;  %v1717_v63 = vsel %vm1716_vm5, %v2095_v32, %v1713_v45  ;;  %vm1719_vm6 = vcmp.eq.f32.partialorder %v1718_v8, 8.507059e+37  ;;  %v1896_v28 = vmul.f32 %v1888_v12, %v3567_v33 }
 0x315   : > { %v1783_v20 = vmul.f32 %v1782_v41, %v3661_v1  ;;  %v3724_v13 = vperm.slane %v1905_v6, 1  ;;  %v1722_v5 = vsel %vm1719_vm6, %v1721_v55, %v1717_v63  ;;  %v1772_v51 = vmul.f32 %v1771_v40, %v3661_v1 }
 0x316   : > { %v3728_v62 = vmul.f32 0.70710677, %v3715_v53  ;;  %v1723_v2 = vmul.f32 %v1722_v5, %v1698_v44  ;;  %v1916_v57 = vmul.f32 %v3635_v4, %v1896_v28  ;;  %v1758_v54 = vand.u32 2147483647, %v3701_v15 }
 0x317   : > { %v1784_v21 = vadd.f32 0.112945676, %v1783_v20  ;;  %v2097_v33 = vpop.eup %2096  ;;  %v3734_v3 = vperm.slane %v1925_v17, 2  ;;  %v1738_v27 = vmul.f32 %v1737_v25, %v3508_v10  ;;  %v3739_v32 = vmul.f32 0.70710677, %v3718_v60 }
 0x318   : > { %v1944_v6 = vld [vmem:[%s3652_s19 + $0x10] sm:$0xff]  ;;  %v1806_v19 = vmul.f32 %v3728_v62, %v3728_v62  ;;  %v2059_v36 = vclamps-f32 %v1723_v2, 1.0  ;;  %v1936_v47 = vadd.f32 %v3709_v52, %v1916_v57  ;;  %v1750_v43 = vmul.f32 %v2097_v33, %v3701_v15 }
 0x319   : > { %v1760_v56 = vand.u32 2147483648, %v3701_v15  ;;  %v1773_v38 = vadd.f32 0.05243302, %v1772_v51  ;;  %v1785_v58 = vmul.f32 %v1784_v21, %v3661_v1  ;;  %v3748_v17 = vld [vmem:[%s3652_s19 + $0x30] sm:$0xff]  ;;  %v1846_v18 = vmul.f32 %v3739_v32, %v3739_v32 }
 0x31a   : > { %v3750_v10 = vmin.f32 %v1806_v19, 16.0  ;;  %v1889_v8 = vadd.f32 1.0, %v2059_v36  ;;  %v1952_v23 = vadd.f32 %v1944_v6, %v1936_v47  ;;  %v1751_v59 = vsub.f32 1.0, %v1750_v43 }
 0x31b   : > { %vm3754_vm7 = vcmp.eq.f32.partialorder %v1758_v54, 8.507059e+37  ;;  %vm1754_vm8 = vweird.f32 %v3701_v15  ;;  %v1786_v22 = vadd.f32 0.4994258, %v1785_v58  ;;  %vm1755_vm9 = vweird.f32 %v2097_v33 }
 0x31c   : > { %v1808_v34 = vmul.f32 2.1237322e-06, %v3750_v10  ;;  %v1819_v30 = vmul.f32 3.8918573e-05, %v3750_v10  ;;  %v1897_v9 = vmul.f32 %v1889_v8, %v3570_v31  ;;  %v1752_v46 = vmul.f32 %v2097_v33, %v1751_v59  ;;  %1960 = vst [vmem:[%s3681_s22 + $0x10] sm:$0xff] %v1952_v23  ;;  %vm1756_vm10 = vmor %vm1754_vm8, %vm1755_vm9 }
 0x31d   : > { %v3763_v0 = vmin.f32 %v1846_v18, 16.0  ;;  %v1774_v48 = vmul.f32 %v1773_v38, %v3661_v1  ;;  %v1787_v37 = vmul.f32 %v1786_v22, %v3661_v1  ;;  %v1761_v12 = vor.u32 1.1754944e-38, %v1760_v56 }
 0x31e   : > { %v1809_v7 = vadd.f32 0.00028619796, %v1808_v34  ;;  %v1820_v42 = vadd.f32 0.001143296, %v1819_v30  ;;  %v1917_v26 = vmul.f32 %v3724_v13, %v1897_v9  ;;  %v1753_v44 = vadd.f32 %v2097_v33, %v1752_v46 }
 0x31f   : > { %v1848_v40 = vmul.f32 2.1237322e-06, %v3763_v0  ;;  %v1859_v45 = vmul.f32 3.8918573e-05, %v3763_v0  ;;  %v1788_v41 = vadd.f32 1.0, %v1787_v37  ;;  %v1554_v56 = vmul.f32 0.5, %v3477_v39 }
 0x320   : > { %v1810_v55 = vmul.f32 %v1809_v7, %v3750_v10  ;;  %v1821_v25 = vmul.f32 %v1820_v42, %v3750_v10  ;;  %v1937_v63 = vadd.f32 %v3734_v3, %v1917_v26  ;;  %v1757_v28 = vsel %vm1756_vm10, %v2097_v33, %v1753_v44 }
 0x321   : > { %v1849_v20 = vadd.f32 0.00028619796, %v1848_v40  ;;  %v1860_v5 = vadd.f32 0.001143296, %v1859_v45  ;;  %v1762_v51 = vsel %vm3754_vm7, %v1761_v12, %v1757_v28  ;;  %2098 = vrcp.f32 %v1788_v41 }
 0x322   : > { %v1763_v57 = vmul.f32 %v1762_v51, %v1738_v27  ;;  %v1775_v54 = vadd.f32 0.18741608, %v1774_v48  ;;  %v1811_v21 = vadd.f32 0.0036580483, %v1810_v55  ;;  %v1822_v6 = vadd.f32 0.014752088, %v1821_v25 }
 0x323   : > { %v1945_v31 = vld [vmem:[%s3652_s19 + $0x18] sm:$0xff]  ;;  %v1850_v19 = vmul.f32 %v1849_v20, %v3763_v0  ;;  %v1861_v36 = vmul.f32 %v1860_v5, %v3763_v0  ;;  %v1800_v37 = vand.u32 2147483648, %v1788_v41  ;;  %v1798_v40 = vand.u32 2147483647, %v1788_v41 }
 0x324   : > { %v3779_v2 = vld [vmem:[%s3652_s19 + $0x38] sm:$0xff]  ;;  %v1953_v15 = vadd.f32 %v1945_v31, %v1937_v63  ;;  %v2060_v47 = vclamps-f32 %v1763_v57, 1.0  ;;  %v1823_v33 = vmul.f32 %v1822_v6, %v3750_v10  ;;  %v1776_v58 = vmul.f32 %v1775_v54, %v3661_v1 }
 0x325   : > { %v1862_v43 = vadd.f32 0.014752088, %v1861_v36  ;;  %v1851_v18 = vadd.f32 0.0036580483, %v1850_v19  ;;  %v1812_v27 = vmul.f32 %v1811_v21, %v3750_v10  ;;  %vm1794_vm12 = vweird.f32 %v1788_v41 }
 0x326   : > { %1961 = vst [vmem:[%s3681_s22 + $0x18] sm:$0xff] %v1953_v15  ;;  %v1890_v38 = vadd.f32 1.0, %v2060_v47  ;;  %v1824_v23 = vadd.f32 0.112945676, %v1823_v33  ;;  %v1777_v46 = vadd.f32 1.1283791, %v1776_v58 }
 0x327   : > { %v2099_v8 = vpop.eup %2098  ;;  %v1863_v59 = vmul.f32 %v1862_v43, %v3763_v0  ;;  %v1852_v39 = vmul.f32 %v1851_v18, %v3763_v0  ;;  %v1813_v1 = vadd.f32 0.05243302, %v1812_v27  ;;  %v1801_v25 = vor.u32 1.1754944e-38, %v1800_v37 }
 0x328   : > { %v1898_v61 = vmul.f32 %v1890_v38, %v1554_v56  ;;  %v1790_v22 = vmul.f32 %v2099_v8, %v1788_v41  ;;  %v1825_v34 = vmul.f32 %v1824_v23, %v3750_v10  ;;  %vm1795_vm11 = vweird.f32 %v2099_v8 }
 0x329   : > { %v1864_v30 = vadd.f32 0.112945676, %v1863_v59  ;;  %v1853_v55 = vadd.f32 0.05243302, %v1852_v39  ;;  %vm1796_vm13 = vmor %vm1794_vm12, %vm1795_vm11  ;;  %v1814_v63 = vmul.f32 %v1813_v1, %v3750_v10  ;;  %vm1799_vm14 = vcmp.eq.f32.partialorder %v1798_v40, 8.507059e+37 }
 0x32a   : > { %v1918_v9 = vmul.f32 %v3498_v49, %v1898_v61  ;;  %v1791_v48 = vsub.f32 1.0, %v1790_v22  ;;  %v1826_v7 = vadd.f32 0.4994258, %v1825_v34  ;;  %v1555_v21 = vmul.f32 0.5, %v3526_v24 }
 0x32b   : > { %v1865_v42 = vmul.f32 %v1864_v30, %v3763_v0  ;;  %v1815_v41 = vadd.f32 0.18741608, %v1814_v63  ;;  %v1556_v40 = vmul.f32 0.5, %v3715_v53 }
 0x32c   : > { %v1938_v26 = vadd.f32 %v3546_v50, %v1918_v9  ;;  %v1792_v44 = vmul.f32 %v2099_v8, %v1791_v48  ;;  %v1827_v45 = vmul.f32 %v1826_v7, %v3750_v10  ;;  %v1778_v50 = vmul.f32 %v1777_v46, %v3625_v29 }
 0x32d   : > { %v1866_v31 = vadd.f32 0.4994258, %v1865_v42  ;;  %v1816_v47 = vmul.f32 %v1815_v41, %v3750_v10 }
 0x32e   : > { %v1954_v49 = vadd.f32 %v3684_v14, %v1938_v26  ;;  %v1793_v12 = vadd.f32 %v2099_v8, %v1792_v44  ;;  %v1828_v28 = vadd.f32 1.0, %v1827_v45  ;;  %v1854_v14 = vmul.f32 %v1853_v55, %v3763_v0 }
 0x32f   : > { %v1867_v20 = vmul.f32 %v1866_v31, %v3763_v0  ;;  %v1817_v18 = vadd.f32 1.1283791, %v1816_v47 }
 0x330   : > { %1962 = vst [vmem:[%s3681_s22 + $0x20] sm:$0xff] %v1954_v49  ;;  %v1797_v5 = vsel %vm1796_vm13, %v2099_v8, %v1793_v12  ;;  %2100 = vrcp.f32 %v1828_v28  ;;  %v1855_v19 = vadd.f32 0.18741608, %v1854_v14  ;;  %v1840_v8 = vand.u32 2147483648, %v1828_v28 }
 0x331   : > { %v1802_v51 = vsel %vm1799_vm14, %v1801_v25, %v1797_v5  ;;  %v1868_v57 = vadd.f32 1.0, %v1867_v20  ;;  %v1838_v59 = vand.u32 2147483647, %v1828_v28  ;;  %vm1834_vm0 = vweird.f32 %v1828_v28 }
 0x332   : > { %v1803_v15 = vmul.f32 %v1802_v51, %v1778_v50  ;;  %v1856_v58 = vmul.f32 %v1855_v19, %v3763_v0  ;;  %v1818_v46 = vmul.f32 %v1817_v18, %v3728_v62  ;;  %v1557_v49 = vmul.f32 0.5, %v3718_v60 }
 0x333   : > { %2102 = vrcp.f32 %v1868_v57  ;;  %v1880_v30 = vand.u32 2147483648, %v1868_v57  ;;  %v1878_v0 = vand.u32 2147483647, %v1868_v57  ;;  %vm1839_vm3 = vcmp.eq.f32.partialorder %v1838_v59, 8.507059e+37 }
 0x334   : > { %v2061_v54 = vclamps-f32 %v1803_v15, 1.0  ;;  %v1857_v34 = vadd.f32 1.1283791, %v1856_v58  ;;  %vm1874_vm4 = vweird.f32 %v1868_v57 }
 0x335   : > { %v1881_v1 = vor.u32 1.1754944e-38, %v1880_v30  ;;  %vm1879_vm6 = vcmp.eq.f32.partialorder %v1878_v0, 8.507059e+37 }
 0x336   : > { %v1891_v6 = vadd.f32 1.0, %v2061_v54  ;;  %v2101_v36 = vpop.eup %2100 }
 0x337   : > { %v1830_v29 = vmul.f32 %v2101_v36, %v1828_v28  ;;  %vm1835_vm15 = vweird.f32 %v2101_v36 }
 0x338   : > { %v1899_v33 = vmul.f32 %v1891_v6, %v1555_v21  ;;  %vm1836_vm1 = vmor %vm1834_vm0, %vm1835_vm15 }
 0x339   : > { %v2103_v43 = vpop.eup %2102  ;;  %v1831_v38 = vsub.f32 1.0, %v1830_v29 }
 0x33a   : > { %v1919_v56 = vmul.f32 %v3532_v35, %v1899_v33  ;;  %v1870_v27 = vmul.f32 %v2103_v43, %v1868_v57  ;;  %v1841_v35 = vor.u32 1.1754944e-38, %v1840_v8  ;;  %vm1875_vm2 = vweird.f32 %v2103_v43 }
 0x33b   : > { %v1832_v24 = vmul.f32 %v2101_v36, %v1831_v38  ;;  %vm1876_vm5 = vmor %vm1874_vm4, %vm1875_vm2 }
 0x33c   : > { %v1939_v23 = vadd.f32 %v3548_v11, %v1919_v56  ;;  %v1871_v61 = vsub.f32 1.0, %v1870_v27 }
 0x33d   : > { %v1833_v22 = vadd.f32 %v2101_v36, %v1832_v24 }
 0x33e   : > { %v1955_v10 = vadd.f32 %v3692_v16, %v1939_v23  ;;  %v1872_v9 = vmul.f32 %v2103_v43, %v1871_v61  ;;  %v1858_v16 = vmul.f32 %v1857_v34, %v3739_v32 }
 0x33f   : > { %v1837_v48 = vsel %vm1836_vm1, %v2101_v36, %v1833_v22 }
 0x340   : > { %1963 = vst [vmem:[%s3681_s22 + $0x28] sm:$0xff] %v1955_v10  ;;  %v1842_v11 = vsel %vm1839_vm3, %v1841_v35, %v1837_v48  ;;  %v1873_v39 = vadd.f32 %v2103_v43, %v1872_v9 }
 0x341   : > { %v1843_v37 = vmul.f32 %v1842_v11, %v1818_v46 }
 0x342   : > { %v1877_v7 = vsel %vm1876_vm5, %v2103_v43, %v1873_v39 }
 0x343   : > { %v2062_v42 = vclamps-f32 %v1843_v37, 1.0  ;;  %v1882_v26 = vsel %vm1879_vm6, %v1881_v1, %v1877_v7 }
 0x344   : > { %v1883_v44 = vmul.f32 %v1882_v26, %v1858_v16 }
 0x345   : > { %v1892_v62 = vadd.f32 1.0, %v2062_v42 }
 0x346   : > { %v2063_v45 = vclamps-f32 %v1883_v44, 1.0 }
 0x347   : > { %v1900_v31 = vmul.f32 %v1892_v62, %v1556_v40 }
 0x348   : > { %v1893_v12 = vadd.f32 1.0, %v2063_v45 }
 0x349   : > { %v1920_v55 = vmul.f32 %v3635_v4, %v1900_v31 }
 0x34a   : > { %v1901_v25 = vmul.f32 %v1893_v12, %v1557_v49 }
 0x34b   : > { %v1940_v32 = vadd.f32 %v3709_v52, %v1920_v55 }
 0x34c   : > { %v1921_v63 = vmul.f32 %v3724_v13, %v1901_v25 }
 0x34d   : > { %v1956_v28 = vadd.f32 %v3748_v17, %v1940_v32 }
 0x34e   : > { %v1941_v20 = vadd.f32 %v3734_v3, %v1921_v63 }
 0x34f   : > { %1964 = vst [vmem:[%s3681_s22 + $0x30] sm:$0xff] %v1956_v28 }
 0x350   : > { %v1957_v53 = vadd.f32 %v3779_v2, %v1941_v20 }
 0x352   : > { %1965 = vst [vmem:[%s3681_s22 + $0x38] sm:$0xff] %v1957_v53 }
 0x353 PF: > { %s15_s18 = sadd.s32 1, %s2120_s18  }
 0x354   : > { %p12_p4 = scmp.ge.s32.totalorder %s15_s18, 4  }
 0x356   :  { %14 = sbr.rel (!%p12_p4) target bundleno = 1 (0x1), region = 76 }

</bundles_post_ra>
